<compile_context>
chip_gen: v6e
topology: v6e:2x2x1
jax: 0.10.0
libtpu: 0.0.40
codegen_flags: <defaults>
</compile_context>

<pallas_src>
import functools

import numpy as np
import jax
import jax.numpy as jnp
from jax import lax
from jax.experimental import pallas as pl
from jax.experimental.pallas import tpu as pltpu


def _round_up(n, m):
    return ((n + m - 1) // m) * m


def _cmrf_kernel(lamda_ref, lab_ref, x_ref, a_ref, b_ref,
                 ws_ref, dx_ref, contrib_acc, *, fb, vp, r):
    g = pl.program_id(1)                      # factor-block step (reduction axis, innermost)
    last_g = pl.num_programs(1) - 1

    lam = lamda_ref[0, 0]
    fbvp = fb * vp
    fbr = fb * r
    st = dx_ref.shape[0]                      # sample-tile rows (sublanes)
    dp = dx_ref.shape[1]                      # padded dims (lanes)

    @pl.when(g == 0)
    def _init():
        ws_ref[...] = jnp.zeros_like(ws_ref)  # log(Phat) - log(P) accumulator (resident output)

    row0 = pl.multiple_of(g * fbvp, 8)        # sublane-aligned offset into labels / contribs

    # --- one-hot column selection for this factor block, rebuilt from int labels ----------
    # (labels == -1, used for V / factor padding, give all-zero rows and contribute nothing)
    lab_blk = lab_ref[pl.ds(row0, fbvp), :]                                   # (fbvp, 1) int32
    col = lax.broadcasted_iota(jnp.int32, (fbvp, dp), 1)
    s_blk = (col == lab_blk).astype(jnp.float32)                              # (fbvp, dp)

    # --- gather x[:, label] for the whole block with one NT matmul (x streamed from ref) ---
    sel = lax.dot_general(s_blk, x_ref[...], (((1,), (1,)), ((), ())),
                          preferred_element_type=jnp.float32)                 # (fbvp, st)
    sig_sel = 1.0 / (1.0 + jnp.exp(-lam * sel))
    dis_sel = (sel > 0.5).astype(jnp.float32)                                 # cheaper than sign()

    a_blk = a_ref[0]                          # (fbr, fbvp) block-diagonal over the fb factors
    b_blk = b_ref[0]                          # (fbr, 1)

    # --- single MXU pass (contraction width fbvp) for each exp term ------------------------
    e_sig = jnp.exp(jnp.dot(a_blk, sig_sel, preferred_element_type=jnp.float32) + b_blk)
    e_dis = jnp.exp(jnp.dot(a_blk, dis_sel, preferred_element_type=jnp.float32) + b_blk)

    # Tiny iota-built selection matrices: s_sum sums each factor's R rows, s_exp broadcasts a
    # per-factor row back over its R rows (avoids sublane reshapes of (fbr, st) data).
    fi = lax.broadcasted_iota(jnp.int32, (fb, fbr), 0)
    ci = lax.broadcasted_iota(jnp.int32, (fb, fbr), 1)
    d = ci - fi * r
    s_sum = ((d >= 0) & (d < r)).astype(jnp.float32)                          # (fb, fbr)
    ri = lax.broadcasted_iota(jnp.int32, (fbr, fb), 0)
    gi = lax.broadcasted_iota(jnp.int32, (fbr, fb), 1)
    d2 = ri - gi * r
    s_exp = ((d2 >= 0) & (d2 < r)).astype(jnp.float32)                        # (fbr, fb)

    ph = jnp.dot(s_sum, e_sig, preferred_element_type=jnp.float32)            # (fb, st)
    pd = jnp.dot(s_sum, e_dis, preferred_element_type=jnp.float32)            # (fb, st)

    # log-domain running importance weight: sum_f [log(Ph_f) - log(P_f)] (padded factors -> 0)
    ws_ref[0] = ws_ref[0] + jnp.sum(jnp.log(ph) - jnp.log(pd), axis=0, keepdims=True)

    # contrib[f*vp + j, k] = sum_r a_f[r, j] * e_sig_f[r, k] / Ph_f[k]  (EUP approx reciprocal)
    inv_ph = pl.reciprocal(ph, approx=True)                                   # (fb, st)
    e_norm = e_sig * jnp.dot(s_exp, inv_ph, preferred_element_type=jnp.float32)
    contrib = jnp.dot(a_blk.T, e_norm, preferred_element_type=jnp.float32)    # (fbvp, st)
    contrib_acc[pl.ds(row0, fbvp), :] = contrib                               # compact store, no RMW

    @pl.when(g == last_g)
    def _finish():
        # One deferred scatter matmul over ALL factors (contraction width F_pad*vp), then the
        # dsig scale computed exactly once per sample tile.
        lab_all = lab_ref[...]                                                # (Fp*vp, 1)
        col_all = lax.broadcasted_iota(jnp.int32, (lab_all.shape[0], dp), 1)
        s_all = (col_all == lab_all).astype(jnp.float32)                      # (Fp*vp, dp)
        dxg = jnp.dot(contrib_acc[...].T, s_all,
                      preferred_element_type=jnp.float32)                     # (st, dp)
        x_tile = x_ref[...]
        sigx = 1.0 / (1.0 + jnp.exp(-lam * x_tile))
        dx_ref[...] = dxg * (lam * sigx * (1.0 - sigx))
        ws_ref[0] = jnp.exp(ws_ref[0])                                        # back from log-domain


def cmrf_forward(x, lamda, A, B, labels, dims, *,
                 factors_per_step=None, samples_per_step=256):
    """Returns (w_s: (samples,), Dx: (samples, dims)) matching CMRF.forward(x, lamda)."""
    x = jnp.asarray(x, jnp.float32)
    A = jnp.asarray(A, jnp.float32)
    B = jnp.asarray(B, jnp.float32)
    labels = jnp.asarray(labels, jnp.int32)

    samples = x.shape[0]
    F, R, V = A.shape

    vp = _round_up(V, 8)                                  # per-factor variable slots (sublane mult)
    if factors_per_step is None:
        factors_per_step = max(1, -(-128 // vp))          # fill a 128-wide MXU contraction
    fb = int(factors_per_step)
    f_pad = _round_up(F, fb)                              # pad with neutral (a=0, b=0) factors
    nfb = f_pad // fb

    st = min(_round_up(samples, 8), _round_up(int(samples_per_step), 8))   # sample-tile rows
    sp = _round_up(samples, st)
    nsb = sp // st
    dp = _round_up(dims, 128)                             # lane-dense Dx stores (unmasked vst)

    # ---------------- host-side packing ----------------
    x_p = jnp.zeros((sp, dp), jnp.float32).at[:samples, :dims].set(x)

    # Block-diagonal, lane-dense A per grid step: a_bd[g, f*R + r, f*vp + j] = A[g*fb + f, r, j]
    a_pad = jnp.zeros((f_pad, R, vp), jnp.float32).at[:F, :, :V].set(A).reshape(nfb, fb, R, vp)
    eye = jnp.eye(fb, dtype=jnp.float32)
    a_bd = jnp.einsum('gfrj,fh->gfrhj', a_pad, eye).reshape(nfb, fb * R, fb * vp)
    b_bd = jnp.zeros((f_pad, R), jnp.float32).at[:F, :].set(B).reshape(nfb, fb * R, 1)

    lab_p = jnp.full((f_pad, vp), -1, jnp.int32).at[:F, :V].set(labels).reshape(f_pad * vp, 1)
    lam_arr = jnp.full((1, 1), lamda, dtype=jnp.float32)

    # ---------------- chip-aware VMEM budget (residents are double-buffered by default) ----
    def _tile_bytes(rows, cols):
        return 4 * _round_up(rows, 8) * _round_up(cols, 128)

    try:
        phys_vmem = int(pltpu.get_tpu_info().vmem_capacity_bytes)
    except Exception:
        phys_vmem = 64 * 2**20                            # conservative fallback (v7x per-core)

    est = (2 * _tile_bytes(st, dp)                        # x sample tile
           + 2 * _tile_bytes(st, dp)                      # Dx out tile
           + 2 * _tile_bytes(1, st)                       # w_s out tile
           + 2 * _tile_bytes(f_pad * vp, 1)               # labels (resident)
           + 2 * _tile_bytes(fb * R, fb * vp)             # block-diagonal A tile
           + 2 * _tile_bytes(fb * R, 1)                   # bias tile
           + _tile_bytes(f_pad * vp, st))                 # contribution scratch (single buffer)
    vmem_limit = int(min(max(2 * est, 16 * 2**20), (phys_vmem * 3) // 4))

    kernel = functools.partial(_cmrf_kernel, fb=fb, vp=vp, r=R)

    ws_raw, dx_p = pl.pallas_call(
        kernel,
        out_shape=(jax.ShapeDtypeStruct((nsb, 1, st), jnp.float32),
                   jax.ShapeDtypeStruct((sp, dp), jnp.float32)),
        grid_spec=pltpu.PrefetchScalarGridSpec(
            num_scalar_prefetch=0,
            grid=(nsb, nfb),                              # samples (parallel) x factor blocks (red.)
            in_specs=[
                pl.BlockSpec(memory_space=pltpu.MemorySpace.SMEM),            # lamda scalar
                pl.BlockSpec((f_pad * vp, 1), lambda i, g: (0, 0)),           # labels (resident)
                pl.BlockSpec((st, dp), lambda i, g: (i, 0)),                  # x sample tile
                pl.BlockSpec((1, fb * R, fb * vp), lambda i, g: (g, 0, 0)),   # block-diag A
                pl.BlockSpec((1, fb * R, 1), lambda i, g: (g, 0, 0)),         # bias block
            ],
            out_specs=[
                pl.BlockSpec((1, 1, st), lambda i, g: (i, 0, 0)),             # log-w -> w per tile
                pl.BlockSpec((st, dp), lambda i, g: (i, 0)),                  # Dx sample tile
            ],
            scratch_shapes=[
                pltpu.VMEM((f_pad * vp, st), jnp.float32),                    # compact contribs
            ],
        ),
        compiler_params=pltpu.CompilerParams(
            dimension_semantics=("parallel", "arbitrary"),
            vmem_limit_bytes=vmem_limit),
    )(lam_arr, lab_p, x_p, a_bd, b_bd)

    ws_raw = ws_raw.reshape(sp)[:samples]
    ws = ws_raw / jnp.sum(ws_raw)                         # global normalization outside the kernel
    return ws, dx_p[:samples, :dims]


def cmrf_reference_np(x, lamda, A, B, labels):
    """Pure-numpy float64 reference mirroring the PyTorch forward loop."""
    x = np.asarray(x, np.float64)
    A = np.asarray(A, np.float64)
    B = np.asarray(B, np.float64)
    samples, dims = x.shape
    F = A.shape[0]
    x_disc = (np.sign(x - 0.5) + 1.0) / 2.0
    expx = np.exp(-lamda * x)
    sigx = 1.0 / (1.0 + expx)
    dsig = lamda * expx / (1.0 + expx) ** 2
    Phat = np.ones(samples)
    P = np.ones(samples)
    Dx = np.zeros((samples, dims))
    for f in range(F):
        a = A[f]
        b = B[f][:, None]
        lab = list(labels[f])
        expterm = np.exp(a @ sigx[:, lab].T + b)          # (R, samples)
        Ph = expterm.sum(0)
        Phat *= Ph
        P *= np.exp(a @ x_disc[:, lab].T + b).sum(0)
        contrib = (a.T @ expterm) / Ph[None, :]           # (V, samples)
        for j, jj in enumerate(lab):
            Dx[:, jj] += contrib[j, :]
    Dx *= dsig
    ws = Phat / P
    ws = ws / ws.sum()
    return ws, Dx


if __name__ == "__main__":
    key = jax.random.PRNGKey(0)
    samples, dims = 20, 40
    F, R, V = 40, 4, 3                                    # 40 factors, each (4, 3) over 3 variables
    kx, ka, kb, kl = jax.random.split(key, 4)

    x = jax.random.uniform(kx, (samples, dims), dtype=jnp.float32)
    A = 0.3 * jax.random.normal(ka, (F, R, V), dtype=jnp.float32)
    B = 0.1 * jax.random.normal(kb, (F, R), dtype=jnp.float32)
    labels = jax.random.randint(kl, (F, V), 0, dims, dtype=jnp.int32)
    lamda = 2.0

    # Default fb=16 (fb*vp = 128 MXU contraction) -> F=40 pads to 48 = 3 factor blocks with 8
    # neutral padded factors; samples_per_step=16 -> 2 sample tiles (20 padded to 32).
    # Exercises both grid axes, factor/V/sample/dims padding and the deferred scatter.
    ws, dx = cmrf_forward(x, lamda, A, B, labels, dims, samples_per_step=16)
    jax.block_until_ready((ws, dx))

    ws_ref, dx_ref = cmrf_reference_np(np.asarray(x), lamda, np.asarray(A), np.asarray(B),
                                       np.asarray(labels))
    # w_s is exact (log-domain f32); Dx uses the EUP approximate reciprocal for 1/Ph in the
    # gradient path, hence the slightly looser tolerance on Dx.
    np.testing.assert_allclose(np.asarray(ws), ws_ref, rtol=2e-3, atol=1e-6)
    np.testing.assert_allclose(np.asarray(dx), dx_ref, rtol=5e-3, atol=5e-4)

    print("KERNEL_OK")
</pallas_src>

<mosaic_0001>
module attributes {stable_mosaic.version = 11 : i64} {
  func.func @_cmrf_kernel(%arg0: i32, %arg1: i32, %arg2: memref<1x1xf32, #tpu.memory_space<smem>>, %arg3: memref<384x1xi32, #tpu.memory_space<vmem>>, %arg4: memref<16x128xf32, #tpu.memory_space<vmem>>, %arg5: memref<1x64x128xf32, #tpu.memory_space<vmem>>, %arg6: memref<1x64x1xf32, #tpu.memory_space<vmem>>, %arg7: memref<1x1x16xf32, #tpu.memory_space<vmem>>, %arg8: memref<16x128xf32, #tpu.memory_space<vmem>>, %arg9: memref<384x16xf32, #tpu.memory_space<vmem>>) attributes {dimension_semantics = [#tpu.dimension_semantics<parallel>, #tpu.dimension_semantics<arbitrary>], iteration_bounds = array<i64: 2, 3>, scalar_prefetch = 0 : i64, scratch_operands = 1 : i64, tpu.core_type = #tpu.core_type<tc>, window_params = [{transform_indices = @transform_0, window_bounds = array<i64: 1, 1>}, {pipeline_mode = #tpu.pipeline_mode<synchronous>, transform_indices = @transform_1, window_bounds = array<i64: 384, 1>}, {transform_indices = @transform_2, window_bounds = array<i64: 16, 128>}, {transform_indices = @transform_3, window_bounds = array<i64: 1, 64, 128>}, {transform_indices = @transform_4, window_bounds = array<i64: 1, 64, 1>}, {transform_indices = @transform_5, window_bounds = array<i64: 1, 1, 16>}, {transform_indices = @transform_6, window_bounds = array<i64: 16, 128>}]} {
    %c0 = arith.constant 0 : index
    %c0_0 = arith.constant 0 : index
    %0 = memref.load %arg2[%c0, %c0_0] : memref<1x1xf32, #tpu.memory_space<smem>>
    %c0_i32 = arith.constant 0 : i32
    %1 = arith.cmpi eq, %arg1, %c0_i32 : i32
    %2 = arith.extui %1 : i1 to i32
    %c0_i32_1 = arith.constant 0 : i32
    %3 = arith.cmpi ne, %2, %c0_i32_1 : i32
    scf.if %3 {
      %cst_35 = arith.constant 0.000000e+00 : f32
      %86 = vector.broadcast %cst_35 : f32 to vector<1x1x16xf32>
      %c0_36 = arith.constant 0 : index
      %c0_37 = arith.constant 0 : index
      %c0_38 = arith.constant 0 : index
      %87 = vector.load %arg7[%c0_36, %c0_37, %c0_38] : memref<1x1x16xf32, #tpu.memory_space<vmem>>, vector<1x1x16xf32>
      tpu.vector_store %arg7[%c0_36, %c0_37, %c0_38], %86 {strides = array<i32>} : memref<1x1x16xf32, #tpu.memory_space<vmem>>, vector<1x1x16xf32>,
    } else {
    }
    %c128_i32 = arith.constant 128 : i32
    %4 = arith.muli %arg1, %c128_i32 : i32
    %5 = tpu.assume_multiple %4, 8 : i32
    %6 = arith.index_cast %5 : i32 to index
    %c0_2 = arith.constant 0 : index
    %7 = vector.load %arg3[%6, %c0_2] : memref<384x1xi32, #tpu.memory_space<vmem>>, vector<128x1xi32>
    %8 = tpu.iota {dimensions = array<i32: 1>} : vector<128x128xi32>
    %9 = vector.broadcast %7 : vector<128x1xi32> to vector<128x128xi32>
    %10 = arith.cmpi eq, %8, %9 : vector<128x128xi32>
    %11 = arith.extui %10 : vector<128x128xi1> to vector<128x128xi32>
    %12 = arith.sitofp %11 : vector<128x128xi32> to vector<128x128xf32>
    %c0_3 = arith.constant 0 : index
    %c0_4 = arith.constant 0 : index
    %13 = vector.load %arg4[%c0_3, %c0_4] : memref<16x128xf32, #tpu.memory_space<vmem>>, vector<16x128xf32>
    %cst = arith.constant dense<0.000000e+00> : vector<128x16xf32>
    %14 = tpu.matmul %12, %13, %cst {dimension_numbers = #tpu.dot_dimension_numbers<[1], [1], [0], [0], [0, 0, 1, 0], [], []>} : vector<128x128xf32>, vector<16x128xf32>, vector<128x16xf32> -> vector<128x16xf32>
    %cst_5 = arith.constant 0.000000e+00 : f32
    %15 = arith.subf %cst_5, %0 : f32
    %16 = vector.broadcast %15 : f32 to vector<128x16xf32>
    %17 = arith.mulf %16, %14 : vector<128x16xf32>
    %18 = math.exp %17 : vector<128x16xf32>
    %cst_6 = arith.constant 1.000000e+00 : f32
    %19 = vector.broadcast %cst_6 : f32 to vector<128x16xf32>
    %20 = arith.addf %19, %18 : vector<128x16xf32>
    %cst_7 = arith.constant 1.000000e+00 : f32
    %21 = vector.broadcast %cst_7 : f32 to vector<128x16xf32>
    %22 = arith.divf %21, %20 : vector<128x16xf32>
    %cst_8 = arith.constant 5.000000e-01 : f32
    %23 = vector.broadcast %cst_8 : f32 to vector<128x16xf32>
    %24 = arith.cmpf ogt, %14, %23 : vector<128x16xf32>
    %25 = arith.extui %24 : vector<128x16xi1> to vector<128x16xi32>
    %26 = arith.sitofp %25 : vector<128x16xi32> to vector<128x16xf32>
    %c0_9 = arith.constant 0 : index
    %c0_10 = arith.constant 0 : index
    %c0_11 = arith.constant 0 : index
    %27 = vector.load %arg5[%c0_9, %c0_10, %c0_11] : memref<1x64x128xf32, #tpu.memory_space<vmem>>, vector<1x64x128xf32>
    %28 = vector.shape_cast %27 : vector<1x64x128xf32> to vector<64x128xf32>
    %c0_12 = arith.constant 0 : index
    %c0_13 = arith.constant 0 : index
    %c0_14 = arith.constant 0 : index
    %29 = vector.load %arg6[%c0_12, %c0_13, %c0_14] : memref<1x64x1xf32, #tpu.memory_space<vmem>>, vector<1x64x1xf32>
    %30 = vector.shape_cast %29 : vector<1x64x1xf32> to vector<64x1xf32>
    %cst_15 = arith.constant dense<0.000000e+00> : vector<64x16xf32>
    %31 = tpu.matmul %28, %22, %cst_15 {dimension_numbers = #tpu.dot_dimension_numbers<[1], [0], [0], [1], [0, 0, 1, 1], [], []>} : vector<64x128xf32>, vector<128x16xf32>, vector<64x16xf32> -> vector<64x16xf32>
    %32 = vector.broadcast %30 : vector<64x1xf32> to vector<64x16xf32>
    %33 = arith.addf %31, %32 : vector<64x16xf32>
    %34 = math.exp %33 : vector<64x16xf32>
    %cst_16 = arith.constant dense<0.000000e+00> : vector<64x16xf32>
    %35 = tpu.matmul %28, %26, %cst_16 {dimension_numbers = #tpu.dot_dimension_numbers<[1], [0], [0], [1], [0, 0, 1, 1], [], []>} : vector<64x128xf32>, vector<128x16xf32>, vector<64x16xf32> -> vector<64x16xf32>
    %36 = vector.broadcast %30 : vector<64x1xf32> to vector<64x16xf32>
    %37 = arith.addf %35, %36 : vector<64x16xf32>
    %38 = math.exp %37 : vector<64x16xf32>
    %39 = tpu.iota {dimensions = array<i32: 0>} : vector<16x64xi32>
    %40 = tpu.iota {dimensions = array<i32: 1>} : vector<16x64xi32>
    %c4_i32 = arith.constant 4 : i32
    %41 = vector.broadcast %c4_i32 : i32 to vector<16x64xi32>
    %42 = arith.muli %39, %41 : vector<16x64xi32>
    %43 = arith.subi %40, %42 : vector<16x64xi32>
    %c0_i32_17 = arith.constant 0 : i32
    %44 = vector.broadcast %c0_i32_17 : i32 to vector<16x64xi32>
    %45 = arith.cmpi sge, %43, %44 : vector<16x64xi32>
    %c4_i32_18 = arith.constant 4 : i32
    %46 = vector.broadcast %c4_i32_18 : i32 to vector<16x64xi32>
    %47 = arith.cmpi slt, %43, %46 : vector<16x64xi32>
    %48 = arith.andi %45, %47 : vector<16x64xi1>
    %49 = arith.extui %48 : vector<16x64xi1> to vector<16x64xi32>
    %50 = arith.sitofp %49 : vector<16x64xi32> to vector<16x64xf32>
    %51 = tpu.iota {dimensions = array<i32: 0>} : vector<64x16xi32>
    %52 = tpu.iota {dimensions = array<i32: 1>} : vector<64x16xi32>
    %c4_i32_19 = arith.constant 4 : i32
    %53 = vector.broadcast %c4_i32_19 : i32 to vector<64x16xi32>
    %54 = arith.muli %52, %53 : vector<64x16xi32>
    %55 = arith.subi %51, %54 : vector<64x16xi32>
    %c0_i32_20 = arith.constant 0 : i32
    %56 = vector.broadcast %c0_i32_20 : i32 to vector<64x16xi32>
    %57 = arith.cmpi sge, %55, %56 : vector<64x16xi32>
    %c4_i32_21 = arith.constant 4 : i32
    %58 = vector.broadcast %c4_i32_21 : i32 to vector<64x16xi32>
    %59 = arith.cmpi slt, %55, %58 : vector<64x16xi32>
    %60 = arith.andi %57, %59 : vector<64x16xi1>
    %61 = arith.extui %60 : vector<64x16xi1> to vector<64x16xi32>
    %62 = arith.sitofp %61 : vector<64x16xi32> to vector<64x16xf32>
    %cst_22 = arith.constant dense<0.000000e+00> : vector<16x16xf32>
    %63 = tpu.matmul %50, %34, %cst_22 {dimension_numbers = #tpu.dot_dimension_numbers<[1], [0], [0], [1], [0, 0, 1, 1], [], []>} : vector<16x64xf32>, vector<64x16xf32>, vector<16x16xf32> -> vector<16x16xf32>
    %cst_23 = arith.constant dense<0.000000e+00> : vector<16x16xf32>
    %64 = tpu.matmul %50, %38, %cst_23 {dimension_numbers = #tpu.dot_dimension_numbers<[1], [0], [0], [1], [0, 0, 1, 1], [], []>} : vector<16x64xf32>, vector<64x16xf32>, vector<16x16xf32> -> vector<16x16xf32>
    %c0_24 = arith.constant 0 : index
    %c0_25 = arith.constant 0 : index
    %c0_26 = arith.constant 0 : index
    %65 = vector.load %arg7[%c0_24, %c0_25, %c0_26] : memref<1x1x16xf32, #tpu.memory_space<vmem>>, vector<1x1x16xf32>
    %66 = vector.shape_cast %65 : vector<1x1x16xf32> to vector<1x16xf32>
    %67 = math.log %63 : vector<16x16xf32>
    %68 = math.log %64 : vector<16x16xf32>
    %69 = arith.subf %67, %68 : vector<16x16xf32>
    %cst_27 = arith.constant dense<0.000000e+00> : vector<16xf32>
    %70 = vector.multi_reduction <add>, %69, %cst_27 [0] : vector<16x16xf32> to vector<16xf32>
    %71 = vector.shape_cast %70 : vector<16xf32> to vector<1x16xf32>
    %72 = arith.addf %66, %71 : vector<1x16xf32>
    %c0_28 = arith.constant 0 : index
    %c0_29 = arith.constant 0 : index
    %c0_30 = arith.constant 0 : index
    %73 = vector.load %arg7[%c0_28, %c0_29, %c0_30] : memref<1x1x16xf32, #tpu.memory_space<vmem>>, vector<1x1x16xf32>
    %74 = vector.shape_cast %73 : vector<1x1x16xf32> to vector<1x16xf32>
    %75 = vector.shape_cast %72 : vector<1x16xf32> to vector<1x1x16xf32>
    tpu.vector_store %arg7[%c0_28, %c0_29, %c0_30], %75 {strides = array<i32>} : memref<1x1x16xf32, #tpu.memory_space<vmem>>, vector<1x1x16xf32>,
    %76 = tpu.reciprocal %63 {approx = true} : vector<16x16xf32> -> vector<16x16xf32>
    %cst_31 = arith.constant dense<0.000000e+00> : vector<64x16xf32>
    %77 = tpu.matmul %62, %76, %cst_31 {dimension_numbers = #tpu.dot_dimension_numbers<[1], [0], [0], [1], [0, 0, 1, 1], [], []>} : vector<64x16xf32>, vector<16x16xf32>, vector<64x16xf32> -> vector<64x16xf32>
    %78 = arith.mulf %34, %77 : vector<64x16xf32>
    %79 = tpu.transpose %28, [1, 0] : vector<64x128xf32> -> vector<128x64xf32>
    %cst_32 = arith.constant dense<0.000000e+00> : vector<128x16xf32>
    %80 = tpu.matmul %79, %78, %cst_32 {dimension_numbers = #tpu.dot_dimension_numbers<[1], [0], [0], [1], [0, 0, 1, 1], [], []>} : vector<128x64xf32>, vector<64x16xf32>, vector<128x16xf32> -> vector<128x16xf32>
    %81 = arith.index_cast %5 : i32 to index
    %c0_33 = arith.constant 0 : index
    %82 = vector.load %arg9[%81, %c0_33] : memref<384x16xf32, #tpu.memory_space<vmem>>, vector<128x16xf32>
    tpu.vector_store %arg9[%81, %c0_33], %80 {strides = array<i32>} : memref<384x16xf32, #tpu.memory_space<vmem>>, vector<128x16xf32>,
    %c2_i32 = arith.constant 2 : i32
    %83 = arith.cmpi eq, %arg1, %c2_i32 : i32
    %84 = arith.extui %83 : i1 to i32
    %c0_i32_34 = arith.constant 0 : i32
    %85 = arith.cmpi ne, %84, %c0_i32_34 : i32
    scf.if %85 {
      %c0_35 = arith.constant 0 : index
      %c0_36 = arith.constant 0 : index
      %86 = vector.load %arg3[%c0_35, %c0_36] : memref<384x1xi32, #tpu.memory_space<vmem>>, vector<384x1xi32>
      %87 = tpu.iota {dimensions = array<i32: 1>} : vector<384x128xi32>
      %88 = vector.broadcast %86 : vector<384x1xi32> to vector<384x128xi32>
      %89 = arith.cmpi eq, %87, %88 : vector<384x128xi32>
      %90 = arith.extui %89 : vector<384x128xi1> to vector<384x128xi32>
      %91 = arith.sitofp %90 : vector<384x128xi32> to vector<384x128xf32>
      %c0_37 = arith.constant 0 : index
      %c0_38 = arith.constant 0 : index
      %92 = vector.load %arg9[%c0_37, %c0_38] : memref<384x16xf32, #tpu.memory_space<vmem>>, vector<384x16xf32>
      %93 = tpu.transpose %92, [1, 0] : vector<384x16xf32> -> vector<16x384xf32>
      %cst_39 = arith.constant dense<0.000000e+00> : vector<16x128xf32>
      %94 = tpu.matmul %93, %91, %cst_39 {dimension_numbers = #tpu.dot_dimension_numbers<[1], [0], [0], [1], [0, 0, 1, 1], [], []>} : vector<16x384xf32>, vector<384x128xf32>, vector<16x128xf32> -> vector<16x128xf32>
      %c0_40 = arith.constant 0 : index
      %c0_41 = arith.constant 0 : index
      %95 = vector.load %arg4[%c0_40, %c0_41] : memref<16x128xf32, #tpu.memory_space<vmem>>, vector<16x128xf32>
      %cst_42 = arith.constant 0.000000e+00 : f32
      %96 = arith.subf %cst_42, %0 : f32
      %97 = vector.broadcast %96 : f32 to vector<16x128xf32>
      %98 = arith.mulf %97, %95 : vector<16x128xf32>
      %99 = math.exp %98 : vector<16x128xf32>
      %cst_43 = arith.constant 1.000000e+00 : f32
      %100 = vector.broadcast %cst_43 : f32 to vector<16x128xf32>
      %101 = arith.addf %100, %99 : vector<16x128xf32>
      %cst_44 = arith.constant 1.000000e+00 : f32
      %102 = vector.broadcast %cst_44 : f32 to vector<16x128xf32>
      %103 = arith.divf %102, %101 : vector<16x128xf32>
      %104 = vector.broadcast %0 : f32 to vector<16x128xf32>
      %105 = arith.mulf %104, %103 : vector<16x128xf32>
      %cst_45 = arith.constant 1.000000e+00 : f32
      %106 = vector.broadcast %cst_45 : f32 to vector<16x128xf32>
      %107 = arith.subf %106, %103 : vector<16x128xf32>
      %108 = arith.mulf %105, %107 : vector<16x128xf32>
      %109 = arith.mulf %94, %108 : vector<16x128xf32>
      %c0_46 = arith.constant 0 : index
      %c0_47 = arith.constant 0 : index
      %110 = vector.load %arg8[%c0_46, %c0_47] : memref<16x128xf32, #tpu.memory_space<vmem>>, vector<16x128xf32>
      tpu.vector_store %arg8[%c0_46, %c0_47], %109 {strides = array<i32>} : memref<16x128xf32, #tpu.memory_space<vmem>>, vector<16x128xf32>,
      %c0_48 = arith.constant 0 : index
      %c0_49 = arith.constant 0 : index
      %c0_50 = arith.constant 0 : index
      %111 = vector.load %arg7[%c0_48, %c0_49, %c0_50] : memref<1x1x16xf32, #tpu.memory_space<vmem>>, vector<1x1x16xf32>
      %112 = vector.shape_cast %111 : vector<1x1x16xf32> to vector<1x16xf32>
      %113 = math.exp %112 : vector<1x16xf32>
      %c0_51 = arith.constant 0 : index
      %c0_52 = arith.constant 0 : index
      %c0_53 = arith.constant 0 : index
      %114 = vector.load %arg7[%c0_51, %c0_52, %c0_53] : memref<1x1x16xf32, #tpu.memory_space<vmem>>, vector<1x1x16xf32>
      %115 = vector.shape_cast %114 : vector<1x1x16xf32> to vector<1x16xf32>
      %116 = vector.shape_cast %113 : vector<1x16xf32> to vector<1x1x16xf32>
      tpu.vector_store %arg7[%c0_51, %c0_52, %c0_53], %116 {strides = array<i32>} : memref<1x1x16xf32, #tpu.memory_space<vmem>>, vector<1x1x16xf32>,
    } else {
    }
    return
  }
  func.func @transform_0(%arg0: i32, %arg1: i32) -> (i32, i32) {
    %c0_i32 = arith.constant 0 : i32
    %c0_i32_0 = arith.constant 0 : i32
    %c0_i32_1 = arith.constant 0 : i32
    return %c0_i32, %c0_i32_0 : i32, i32
  }
  func.func @transform_1(%arg0: i32, %arg1: i32) -> (i32, i32) {
    %c0_i32 = arith.constant 0 : i32
    %c0_i32_0 = arith.constant 0 : i32
    %c0_i32_1 = arith.constant 0 : i32
    return %c0_i32, %c0_i32_0 : i32, i32
  }
  func.func @transform_2(%arg0: i32, %arg1: i32) -> (i32, i32) {
    %c0_i32 = arith.constant 0 : i32
    %c0_i32_0 = arith.constant 0 : i32
    return %arg0, %c0_i32 : i32, i32
  }
  func.func @transform_3(%arg0: i32, %arg1: i32) -> (i32, i32, i32) {
    %c0_i32 = arith.constant 0 : i32
    %c0_i32_0 = arith.constant 0 : i32
    %c0_i32_1 = arith.constant 0 : i32
    return %arg1, %c0_i32, %c0_i32_0 : i32, i32, i32
  }
  func.func @transform_4(%arg0: i32, %arg1: i32) -> (i32, i32, i32) {
    %c0_i32 = arith.constant 0 : i32
    %c0_i32_0 = arith.constant 0 : i32
    %c0_i32_1 = arith.constant 0 : i32
    return %arg1, %c0_i32, %c0_i32_0 : i32, i32, i32
  }
  func.func @transform_5(%arg0: i32, %arg1: i32) -> (i32, i32, i32) {
    %c0_i32 = arith.constant 0 : i32
    %c0_i32_0 = arith.constant 0 : i32
    %c0_i32_1 = arith.constant 0 : i32
    return %arg0, %c0_i32, %c0_i32_0 : i32, i32, i32
  }
  func.func @transform_6(%arg0: i32, %arg1: i32) -> (i32, i32) {
    %c0_i32 = arith.constant 0 : i32
    %c0_i32_0 = arith.constant 0 : i32
    return %arg0, %c0_i32 : i32, i32
  }
}

</mosaic_0001>

<bundles_post_ra>
// kernel: tpu_custom_call.1
= control target key start
LH: loop header
LB: loop body
LE: loop exit
PB: predicated region body
PF: predicated region fallthrough
CT: control target
= control target key end

     0   :  { %s4389_s0 = inlined_call_operand.<no memory space> [shape: f32[1,1], index: 0, kind: input, shape index: {}]   ;;  %s4390_s1 = inlined_call_operand.vmem [shape: s32[384,1], index: 1, kind: input, shape index: {}]   ;;  %s4391_s2 = inlined_call_operand.vmem [shape: f32[32,128], index: 2, kind: input, shape index: {}]   ;;  %s4392_s3 = inlined_call_operand.vmem [shape: f32[3,64,128], index: 3, kind: input, shape index: {}]   ;;  %s4393_s4 = inlined_call_operand.vmem [shape: f32[3,64,1], index: 4, kind: input, shape index: {}]   ;;  %s4394_s5 = inlined_call_operand.hbm [shape: f32[2,1,16], index: 5, kind: output, shape index: {0}]   ;;  %s4395_s6 = inlined_call_operand.hbm [shape: f32[32,128], index: 6, kind: output, shape index: {1}]  }
   0x1   :  { %12 = sst [smem:[#allocation3]] %s4389_s0 }
   0x2   :  { %13 = vsyncpa [#allocation5], 0 }
   0x3   :  { %15 = vsyncpa [#allocation5 + $0x1], 0 }
   0x4   :  { %16 = vsyncpa [#allocation7], 0 }
   0x5   :  { %18 = vsyncpa [#allocation7 + $0x1], 0  ;;  %s3566_s23 = smov 0   ;;  %s3568_s24 = smov 0  }
   0x6   :  { %s3570_s25 = smov 0   ;;  %s3572_s26 = smov 0  }
   0x7   :  { %s3574_s27 = smov 0   ;;  %s3576_s28 = smov 0  }
   0x8   :  { %s3578_s29 = smov 0   ;;  %s3580_s30 = smov 0  }
   0x9 LB: > { %4400 = sst [smem:[#allocation10_spill]] %s3496_s25  ;;  %s2487_s0 = sadd.s32 4294967295, %s3516_s30   ;;  %s3516_s30 = sphi %s3580_s30, %s24_s30   ;;  %s3512_s29 = sphi %s3578_s29, %s4415_s29   ;;  %s3508_s28 = sphi %s3576_s28, %s4414_s28   ;;  %s3504_s27 = sphi %s3574_s27, %s4413_s27   ;;  %s3500_s26 = sphi %s3572_s26, %s4412_s26   ;;  %s3496_s25 = sphi %s3570_s25, %s4411_s25   ;;  %s3492_s24 = sphi %s3568_s24, %s4417_s24   ;;  %s3488_s23 = sphi %s3566_s23, %s4416_s23  }
   0xa   : > { %4401 = sst [smem:[#allocation11_spill]] %s3508_s28  ;;  %s2488_s7 = sadd.s32 4294967294, %s3516_s30  }
   0xb   : > { %4402 = sst [smem:[#allocation12_spill]] %s3512_s29  ;;  %s33_s8 = sadd.s32 1, %s3508_s28 }
   0xc   : > { %p34_p0 = scmp.ge.s32.totalorder %s33_s8, 3  ;;  %s36_s9 = sadd.s32 1, %s3512_s29 }
   0xd   : > { %p173_p1 = scmp.ne.s32.totalorder %s3496_s25, %s3492_s24  ;;  %p174_p2 = scmp.eq.s32.totalorder %s2487_s0, 5 }
   0xe   : > { %s4419_s8 = smov (%p34_p0, %s33_s8), 0  ;;  %s4421_s9 = smov (!%p34_p0, %s36_s9), %s3512_s29 }
   0xf   : > { %4403 = sst [smem:[#allocation13_spill]] %s4419_s8  ;;  %p3615_p3 = por %p174_p2, %p173_p1 }
  0x10   : > { %p179_p4 = scmp.ne.s32.totalorder %s3492_s24, %s3488_s23  ;;  %p38_p5 = scmp.ge.s32.totalorder %s4421_s9, 2 }
  0x11   : > { %p180_p6 = scmp.eq.s32.totalorder %s2488_s7, 5  ;;  %p2491_p7 = scmp.ge.s32.totalorder %s3516_s30, 1 }
  0x12   : > { %p255_p8 = scmp.lt.s32.totalorder %s3516_s30, 7  ;;  %s4423_s9 = smov (%p38_p5, %s4421_s9), 0 }
  0x13   : > { %4405 = sst [smem:[#allocation14_spill]] %s4423_s9  ;;  %p3625_p9 = por %p180_p6, %p179_p4 }
  0x14   : > { %p256_p10 = pnand %p2491_p7, %p255_p8  ;;  %s160_s12 = ssub.s32 %s3512_s29, %s4423_s9 }
  0x15   : > { %s163_s13 = sadd.s32 1, %s3496_s25  ;;  %p161_p11 = scmp.eq.s32.totalorder %s160_s12, 0 }
  0x16   : > { %259 = sbr.rel (%p256_p10) target bundleno = 1858 (0x742), region = 40  ;;  %s3636_s15 = sand.u32 (!%p256_p10), 1, %s3492_s24  }
  0x17   : > { %s3633_s14 = scalar_select %p161_p11, %s3496_s25, %s163_s13  }
  0x18   : > { %s2493_s16 = sshll.u32 (!%p256_p10), %s3504_s27, 1  ;;  %s2492_s17 = sshll.u32 (!%p256_p10), %s3636_s15, 4 }
  0x19   : > { %4407 = sst [smem:[#allocation15_spill]] %s3633_s14  ;;  %p300_p12 = scmp.lt.s32.totalorder (!%p256_p10), %s2493_s16, 3 }
  0x1a   : > { %p305_p13 = scmp.lt.s32.totalorder (!%p256_p10), %s3500_s26, 2  ;;  %s3641_s18 = sld [smem:[#allocation3]] (!%p256_p10) }
  0x1b   : > { %s4425_s16 = smov (!%p300_p12, %s2493_s16), 3  ;;  %s3660_s14 = scalar_lea.vmem [#allocation4], %s3636_s15 }
  0x1c   : > { %s306_s19 = scalar_select %p305_p13, %s3500_s26, 2 }
  0x1d   : > { %s2494_s20 = sshll.u32 %s4425_s16, 3  ;;  %s3662_s25 = scalar_lea.vmem [#allocation6], %s2492_s17 }
  0x1e   : > { %s3647_s0 = scalar_lea.vmem %s4391_s2, %s2494_s20  ;;  %s2706_s7 = sshll.u32 %s306_s19, 6 }
  0x1f   : > { %s3652_s9 = scalar_lea.vmem %s4392_s3, %s2706_s7  ;;  %s3657_s28 = scalar_lea.vmem %s4393_s4, %s2706_s7 }
  0x20   : > { %p2499_p0 = scmp.ne.s32.totalorder %s3500_s26, 0 }
  0x22   : > { %320 = sbr.rel (%p2499_p0) target bundleno = 41 (0x29), region = 44 }
  0x27   : > { %vm321_vm0 = vcmask 122880   ;;  %v3518_v0 = vmov 0.0  }
  0x28   : > { %322 = vst.msk [vmem:[%s3660_s14] sm:$0x1] %vm321_vm0, %v3518_v0 }
  0x29 PF: > { %s2500_s16 = sshll.u32 %s3500_s26, 7  ;;  %v3519_v1 = vmov 0   ;;  %v440_v8 = vld [vmem:[%s3647_s0 + $0x8] sm:$0xff]  ;;  %v439_v9 = vld [vmem:[%s3647_s0] sm:$0xff]  ;;  %v746_v20 = vld [vmem:[%s3657_s28 + $0x30] sm:$0xff]  ;;  %v341_v28 = vlaneseq  ;;  %v3520_v32 = vmov 1.0  }
  0x2a   : > { %3231 = vset.pattern.permute.xlu1 %v3519_v1  ;;  %3230 = vset.pattern.permute.xlu0 %v3519_v1  ;;  %s3672_s17 = scalar_lea.vmem %s4390_s1, %s2500_s16  ;;  %v747_v21 = vld [vmem:[%s3657_s28 + $0x38] sm:$0xff]  ;;  %v744_v22 = vld [vmem:[%s3657_s28 + $0x20] sm:$0xff]  ;;  %v745_v23 = vld [vmem:[%s3657_s28 + $0x28] sm:$0xff]  ;;  %p2603_p1 = scmp.ne.s32.totalorder %s3500_s26, 2 }
  0x2b   : > { %v327_v2 = vld [vmem:[%s3672_s17 + $0x10] sm:$0xff]  ;;  %v325_v3 = vld [vmem:[%s3672_s17] sm:$0xff]  ;;  %v328_v4 = vld [vmem:[%s3672_s17 + $0x18] sm:$0xff]  ;;  %2885 = vmatprep.subr.mxu0 %v440_v8  ;;  %v3701_v29 = vand.u32 127, %v341_v28 }
  0x2c   : > { %350 = vperm.xlu1 %3231, %v327_v2   ;;  %344 = vperm.xlu0 %3230, %v325_v3   ;;  %v326_v5 = vld [vmem:[%s3672_s17 + $0x8] sm:$0xff]  ;;  %v329_v7 = vld [vmem:[%s3672_s17 + $0x20] sm:$0xff]  ;;  %v332_v10 = vld [vmem:[%s3672_s17 + $0x38] sm:$0xff] }
  0x2d   : > { %v330_v6 = vld [vmem:[%s3672_s17 + $0x28] sm:$0xff]  ;;  %2886 = vmatpush3.xpose.msra.mxu0 %v440_v8  ;;  %v331_v11 = vld [vmem:[%s3672_s17 + $0x30] sm:$0xff]  ;;  %v333_v13 = vld [vmem:[%s3672_s17 + $0x40] sm:$0xff] }
  0x2e   : > { %2887 = vmatprep.subr.mxu0 %v439_v9  ;;  %v334_v12 = vld [vmem:[%s3672_s17 + $0x48] sm:$0xff]  ;;  %v336_v14 = vld [vmem:[%s3672_s17 + $0x58] sm:$0xff]  ;;  %v335_v15 = vld [vmem:[%s3672_s17 + $0x50] sm:$0xff] }
  0x2f   : > { %v338_v16 = vld [vmem:[%s3672_s17 + $0x68] sm:$0xff]  ;;  %v337_v17 = vld [vmem:[%s3672_s17 + $0x60] sm:$0xff]  ;;  %v340_v18 = vld [vmem:[%s3672_s17 + $0x78] sm:$0xff] }
  0x30   : > { %353 = vperm.xlu1 %3231, %v328_v4   ;;  %347 = vperm.xlu0 %3230, %v326_v5   ;;  %v339_v19 = vld [vmem:[%s3672_s17 + $0x70] sm:$0xff]  ;;  %v743_v25 = vld [vmem:[%s3657_s28 + $0x18] sm:$0xff]  ;;  %v740_v26 = vld [vmem:[%s3657_s28] sm:$0xff] }
  0x31   : > { %2888 = vmatpush3.xpose.msra.mxu0 %v439_v9  ;;  %v742_v24 = vld [vmem:[%s3657_s28 + $0x10] sm:$0xff]  ;;  %v741_v27 = vld [vmem:[%s3657_s28 + $0x8] sm:$0xff]  ;;  %v732_v47 = vld [vmem:[%s3652_s9] sm:$0xff]  ;;  %s586_s28 = ssub.f32 0.0, %s3641_s18 }
  0x32   : > { %2945 = vmatprep.mubr.f32.mxu1 %v732_v47  ;;  %v3737_v48 = vld [vmem:[%s3652_s9 + $0x8] sm:$0xff]  ;;  %v3741_v49 = vld [vmem:[%s3652_s9 + $0x10] sm:$0xff]  ;;  %v3745_v50 = vld [vmem:[%s3652_s9 + $0x18] sm:$0xff] }
  0x33   : > { %v3749_v51 = vld [vmem:[%s3652_s9 + $0x20] sm:$0xff]  ;;  %v3753_v52 = vld [vmem:[%s3652_s9 + $0x28] sm:$0xff]  ;;  %v3757_v53 = vld [vmem:[%s3652_s9 + $0x30] sm:$0xff]  ;;  %v3783_v3 = vstv %s586_s28 }
  0x34   : > { %359 = vperm.xlu1 %3231, %v330_v6   ;;  %356 = vperm.xlu0 %3230, %v329_v7   ;;  %v3761_v54 = vld [vmem:[%s3652_s9 + $0x38] sm:$0xff]  ;;  %s1647_s9 = scalar_lea.vmem [#allocation2], %s2500_s16 }
  0x38   : > { %365 = vperm.xlu1 %3231, %v332_v10   ;;  %362 = vperm.xlu0 %3230, %v331_v11  }
  0x3c   : > { %371 = vperm.xlu1 %3231, %v334_v12   ;;  %368 = vperm.xlu0 %3230, %v333_v13  }
  0x40   : > { %377 = vperm.xlu1 %3231, %v336_v14   ;;  %374 = vperm.xlu0 %3230, %v335_v15  }
  0x44   : > { %383 = vperm.xlu1 %3231, %v338_v16   ;;  %380 = vperm.xlu0 %3230, %v337_v17  }
  0x48   : > { %389 = vperm.xlu1 %3231, %v340_v18   ;;  %386 = vperm.xlu0 %3230, %v339_v19  }
  0x4c   : > { %780 = vperm.xlu1 %3231, %v746_v20   ;;  %785 = vperm.xlu0 %3230, %v747_v21  }
  0x50   : > { %770 = vperm.xlu1 %3231, %v744_v22   ;;  %775 = vperm.xlu0 %3230, %v745_v23  }
  0x54   : > { %760 = vperm.xlu1 %3231, %v742_v24   ;;  %765 = vperm.xlu0 %3230, %v743_v25  }
  0x58   : > { %750 = vperm.xlu1 %3231, %v740_v26   ;;  %755 = vperm.xlu0 %3230, %v741_v27  }
  0x76   : > { %1422 = vxpose.xlu0.b32.start [1/8] (short) %v732_v47, 128 }
  0x7a   : > { %1423 = vxpose.xlu0.b32.cont [2/8] (short) %v3737_v48, 128 }
  0x7e   : > { %1424 = vxpose.xlu0.b32.cont [3/8] (short) %v3741_v49, 128 }
  0x82   : > { %1425 = vxpose.xlu0.b32.cont [4/8] (short) %v3745_v50, 128 }
  0x86   : > { %1426 = vxpose.xlu0.b32.cont [5/8] (short) %v3749_v51, 128 }
  0x8a   : > { %1427 = vxpose.xlu0.b32.cont [6/8] (short) %v3753_v52, 128 }
  0x8e   : > { %1428 = vxpose.xlu0.b32.cont [7/8] (short) %v3757_v53, 128 }
  0x92   : > { %1429 = vxpose.xlu0.b32.end [8/8] (short) %v3761_v54, 128 }
  0xa7   : > { %v351_v30 = vpop.permute.xlu1 %350  ;;  %v345_v31 = vpop.permute.xlu0 %344 }
  0xa8   : > { %vm391_vm1 = vcmp.eq.s32.totalorder %v3701_v29, %v345_v31  ;;  %vm393_vm2 = vcmp.eq.s32.totalorder %v3701_v29, %v351_v30 }
  0xa9   : > { %2889 = vmatprep.mubr.msk.f32.mxu0 %vm391_vm1, %v3520_v32 }
  0xab   : > { %v354_v33 = vpop.permute.xlu1 %353  ;;  %v348_v34 = vpop.permute.xlu0 %347 }
  0xac   : > { %vm392_vm3 = vcmp.eq.s32.totalorder %v3701_v29, %v348_v34  ;;  %vm394_vm4 = vcmp.eq.s32.totalorder %v3701_v29, %v354_v33 }
  0xad   : > { %2890 = vmatmul.mubr.msk.f32.vlgmr.msra.gmra.mxu0 %vm392_vm3, %v3520_v32 }
  0xae   : > { %2892 = vmatprep.mubr.msk.f32.mxu0 %vm393_vm2, %v3520_v32 }
  0xaf   : > { %v360_v35 = vpop.permute.xlu1 %359  ;;  %v357_v36 = vpop.permute.xlu0 %356 }
  0xb0   : > { %vm395_vm5 = vcmp.eq.s32.totalorder %v3701_v29, %v357_v36  ;;  %vm396_vm6 = vcmp.eq.s32.totalorder %v3701_v29, %v360_v35 }
  0xb1   : > { %2893 = vmatmul.mubr.msk.f32.gmra.mxu0 %vm394_vm4, %v3520_v32 }
  0xb2   : > { %2895 = vmatprep.mubr.msk.f32.mxu0 %vm395_vm5, %v3520_v32 }
  0xb3   : > { %v366_v37 = vpop.permute.xlu1 %365  ;;  %v363_v38 = vpop.permute.xlu0 %362 }
  0xb4   : > { %vm397_vm7 = vcmp.eq.s32.totalorder %v3701_v29, %v363_v38  ;;  %vm398_vm8 = vcmp.eq.s32.totalorder %v3701_v29, %v366_v37 }
  0xb5   : > { %2896 = vmatmul.mubr.msk.f32.gmra.mxu0 %vm396_vm6, %v3520_v32 }
  0xb6   : > { %2898 = vmatprep.mubr.msk.f32.mxu0 %vm397_vm7, %v3520_v32 }
  0xb7   : > { %v372_v39 = vpop.permute.xlu1 %371  ;;  %v369_v40 = vpop.permute.xlu0 %368 }
  0xb8   : > { %vm399_vm9 = vcmp.eq.s32.totalorder %v3701_v29, %v369_v40  ;;  %vm400_vm10 = vcmp.eq.s32.totalorder %v3701_v29, %v372_v39 }
  0xb9   : > { %2899 = vmatmul.mubr.msk.f32.gmra.mxu0 %vm398_vm8, %v3520_v32 }
  0xba   : > { %2901 = vmatprep.mubr.msk.f32.mxu0 %vm399_vm9, %v3520_v32 }
  0xbb   : > { %v378_v41 = vpop.permute.xlu1 %377  ;;  %v375_v42 = vpop.permute.xlu0 %374 }
  0xbc   : > { %vm401_vm11 = vcmp.eq.s32.totalorder %v3701_v29, %v375_v42  ;;  %vm402_vm12 = vcmp.eq.s32.totalorder %v3701_v29, %v378_v41 }
  0xbd   : > { %2902 = vmatmul.mubr.msk.f32.gmra.mxu0 %vm400_vm10, %v3520_v32 }
  0xbe   : > { %2904 = vmatprep.mubr.msk.f32.mxu0 %vm401_vm11, %v3520_v32 }
  0xbf   : > { %v384_v43 = vpop.permute.xlu1 %383  ;;  %v381_v44 = vpop.permute.xlu0 %380 }
  0xc0   : > { %vm403_vm13 = vcmp.eq.s32.totalorder %v3701_v29, %v381_v44  ;;  %vm404_vm14 = vcmp.eq.s32.totalorder %v3701_v29, %v384_v43 }
  0xc1   : > { %2905 = vmatmul.mubr.msk.f32.gmra.mxu0 %vm402_vm12, %v3520_v32 }
  0xc2   : > { %2907 = vmatprep.mubr.msk.f32.mxu0 %vm403_vm13, %v3520_v32 }
  0xc3   : > { %v387_v45 = vpop.permute.xlu0 %386  ;;  %v390_v46 = vpop.permute.xlu1 %389 }
  0xc4   : > { %vm405_vm15 = vcmp.eq.s32.totalorder %v3701_v29, %v387_v45  ;;  %vm406_vm0 = vcmp.eq.s32.totalorder %v3701_v29, %v390_v46 }
  0xc5   : > { %2908 = vmatmul.mubr.msk.f32.gmra.mxu0 %vm404_vm14, %v3520_v32 }
  0xc6   : > { %2910 = vmatprep.mubr.msk.f32.mxu0 %vm405_vm15, %v3520_v32 }
  0xc9   : > { %2911 = vmatmul.mubr.msk.f32.gmra.mxu0 %vm406_vm0, %v3520_v32 }
  0xca   : > { %2989 = vmatprep.mubr.f32.mxu0 %v732_v47 }
 0x16d   : > { %v3764_v55 = vpop.f32.mrf.mxu0 }
 0x16e   : > { %v589_v42 = vmul.f32 %v3764_v55, %v3783_v3  ;;  %vm685_vm15 = vcmp.gt.f32.partialorder %v3764_v55, 0.5 }
 0x16f   : > { %v3766_v56 = vpop.f32.mrf.mxu0 }
 0x170   : > { %v588_v47 = vmul.f32 %v3783_v3, %v3766_v56  ;;  %vm684_vm0 = vcmp.gt.f32.partialorder %v3766_v56, 0.5 }
 0x171   : > { %v3768_v57 = vpop.f32.mrf.mxu0 }
 0x172   : > { %v591_v33 = vmul.f32 %v3768_v57, %v3783_v3  ;;  %vm687_vm13 = vcmp.gt.f32.partialorder %v3768_v57, 0.5 }
 0x173   : > { %v3770_v58 = vpop.f32.mrf.mxu0 }
 0x174   : > { %v590_v37 = vmul.f32 %v3783_v3, %v3770_v58  ;;  %v610_v43 = vmul.f32 1.442695, %v591_v33  ;;  %vm686_vm14 = vcmp.gt.f32.partialorder %v3770_v58, 0.5 }
 0x175   : > { %v3772_v59 = vpop.f32.mrf.mxu0 }
 0x176   : > { %v593_v26 = vmul.f32 %v3772_v59, %v3783_v3  ;;  %vm689_vm11 = vcmp.gt.f32.partialorder %v3772_v59, 0.5 }
 0x177   : > { %v3774_v60 = vpop.f32.mrf.mxu0 }
 0x178   : > { %v592_v30 = vmul.f32 %v3783_v3, %v3774_v60  ;;  %v614_v34 = vmul.f32 1.442695, %v593_v26  ;;  %vm688_vm12 = vcmp.gt.f32.partialorder %v3774_v60, 0.5 }
 0x179   : > { %v3776_v61 = vpop.f32.mrf.mxu0 }
 0x17a   : > { %v595_v22 = vmul.f32 %v3776_v61, %v3783_v3  ;;  %vm691_vm9 = vcmp.gt.f32.partialorder %v3776_v61, 0.5  ;;  %v612_v38 = vmul.f32 1.442695, %v592_v30  ;;  %v608_v61 = vmul.f32 1.442695, %v590_v37 }
 0x17b   : > { %v3778_v62 = vpop.f32.mrf.mxu0  ;;  %v3866_v37 = vshrl.u32 %v341_v28, 7 }
 0x17c   : > { %v594_v24 = vmul.f32 %v3783_v3, %v3778_v62  ;;  %v618_v27 = vmul.f32 1.442695, %v595_v22  ;;  %vm690_vm10 = vcmp.gt.f32.partialorder %v3778_v62, 0.5 }
 0x17d   : > { %v2903_v63 = vpop.f32.mrf.mxu0 }
 0x17e   : > { %v597_v18 = vmul.f32 %v2903_v63, %v3783_v3  ;;  %vm693_vm7 = vcmp.gt.f32.partialorder %v2903_v63, 0.5  ;;  %v616_v31 = vmul.f32 1.442695, %v594_v24  ;;  %v606_v63 = vmul.f32 1.442695, %v589_v42 }
 0x17f   : > { %v3780_v0 = vpop.f32.mrf.mxu0 }
 0x180   : > { %v596_v20 = vmul.f32 %v3783_v3, %v3780_v0  ;;  %v622_v23 = vmul.f32 1.442695, %v597_v18  ;;  %vm692_vm8 = vcmp.gt.f32.partialorder %v3780_v0, 0.5 }
 0x181   : > { %v2906_v1 = vpop.f32.mrf.mxu0 }
 0x182   : > { %v599_v11 = vmul.f32 %v2906_v1, %v3783_v3  ;;  %vm695_vm5 = vcmp.gt.f32.partialorder %v2906_v1, 0.5  ;;  %v620_v25 = vmul.f32 1.442695, %v596_v20 }
 0x183   : > { %v557_v2 = vpop.f32.mrf.mxu0 }
 0x184   : > { %v598_v16 = vmul.f32 %v3783_v3, %v557_v2  ;;  %v626_v19 = vmul.f32 1.442695, %v599_v11  ;;  %vm694_vm6 = vcmp.gt.f32.partialorder %v557_v2, 0.5  ;;  %v604_v2 = vmul.f32 1.442695, %v588_v47 }
 0x185   : > { %v2909_v4 = vpop.f32.mrf.mxu0 }
 0x186   : > { %v601_v5 = vmul.f32 %v2909_v4, %v3783_v3  ;;  %vm697_vm3 = vcmp.gt.f32.partialorder %v2909_v4, 0.5  ;;  %v624_v21 = vmul.f32 1.442695, %v598_v16 }
 0x187   : > { %v567_v6 = vpop.f32.mrf.mxu0 }
 0x188   : > { %v600_v7 = vmul.f32 %v3783_v3, %v567_v6  ;;  %v630_v9 = vmul.f32 1.442695, %v601_v5  ;;  %vm696_vm4 = vcmp.gt.f32.partialorder %v567_v6, 0.5 }
 0x189   : > { %v2912_v8 = vpop.f32.mrf.mxu0 }
 0x18a   : > { %v603_v10 = vmul.f32 %v2912_v8, %v3783_v3  ;;  %vm699_vm1 = vcmp.gt.f32.partialorder %v2912_v8, 0.5  ;;  %v628_v13 = vmul.f32 1.442695, %v600_v7  ;;  %3232 = vpow2.f32 %v630_v9 }
 0x18b   : > { %v577_v12 = vpop.f32.mrf.mxu0  ;;  %2957 = vmatprep.subr.msk.mxu0 %vm699_vm1, %v3520_v32 }
 0x18c   : > { %v634_v14 = vmul.f32 1.442695, %v603_v10  ;;  %v602_v15 = vmul.f32 %v3783_v3, %v577_v12  ;;  %vm698_vm2 = vcmp.gt.f32.partialorder %v577_v12, 0.5  ;;  %2958 = vmatpush3.msk.msra.mxu0 %vm699_vm1, %v3520_v32 }
 0x18d   : > { %2959 = vmatprep.subr.msk.mxu0 %vm698_vm2, %v3520_v32 }
 0x18e   : > { %v632_v17 = vmul.f32 1.442695, %v602_v15  ;;  %3234 = vpow2.f32 %v634_v14  ;;  %2960 = vmatpush3.msk.msra.mxu0 %vm698_vm2, %v3520_v32 }
 0x18f   : > { %3236 = vpow2.f32 %v628_v13  ;;  %2961 = vmatprep.subr.msk.mxu0 %vm697_vm3, %v3520_v32 }
 0x190   : > { %3238 = vpow2.f32 %v632_v17  ;;  %2962 = vmatpush3.msk.msra.mxu0 %vm697_vm3, %v3520_v32 }
 0x191   : > { %2963 = vmatprep.subr.msk.mxu0 %vm696_vm4, %v3520_v32  ;;  %3240 = vpow2.f32 %v626_v19 }
 0x192   : > { %2964 = vmatpush3.msk.msra.mxu0 %vm696_vm4, %v3520_v32  ;;  %3242 = vpow2.f32 %v624_v21  ;;  %vm1102_vm4 = vcmask 523264  }
 0x193   : > { %2965 = vmatprep.subr.msk.mxu0 %vm695_vm5, %v3520_v32  ;;  %3244 = vpow2.f32 %v622_v23 }
 0x194   : > { %2966 = vmatpush3.msk.msra.mxu0 %vm695_vm5, %v3520_v32  ;;  %3246 = vpow2.f32 %v620_v25 }
 0x195   : > { %2967 = vmatprep.subr.msk.mxu0 %vm694_vm6, %v3520_v32  ;;  %3248 = vpow2.f32 %v618_v27 }
 0x196   : > { %2968 = vmatpush3.msk.msra.mxu0 %vm694_vm6, %v3520_v32  ;;  %3250 = vpow2.f32 %v616_v31 }
 0x197   : > { %2969 = vmatprep.subr.msk.mxu0 %vm693_vm7, %v3520_v32  ;;  %v3233_v35 = vpop.eup %3232  ;;  %3252 = vpow2.f32 %v614_v34 }
 0x198   : > { %2970 = vmatpush3.msk.msra.mxu0 %vm693_vm7, %v3520_v32  ;;  %v649_v44 = vadd.f32 1.0, %v3233_v35 }
 0x199   : > { %2971 = vmatprep.subr.msk.mxu0 %vm692_vm8, %v3520_v32 }
 0x19a   : > { %2972 = vmatpush3.msk.msra.mxu0 %vm692_vm8, %v3520_v32 }
 0x19b   : > { %v3235_v36 = vpop.eup %3234  ;;  %2973 = vmatprep.subr.msk.mxu0 %vm691_vm9, %v3520_v32 }
 0x19c   : > { %v3237_v39 = vpop.eup %3236  ;;  %v651_v40 = vadd.f32 1.0, %v3235_v36  ;;  %2974 = vmatpush3.msk.msra.mxu0 %vm691_vm9, %v3520_v32 }
 0x19d   : > { %v3239_v41 = vpop.eup %3238  ;;  %2975 = vmatprep.subr.msk.mxu0 %vm690_vm10, %v3520_v32  ;;  %v648_v62 = vadd.f32 1.0, %v3237_v39 }
 0x19e   : > { %3254 = vrcp.f32 %v651_v40  ;;  %v650_v45 = vadd.f32 1.0, %v3239_v41  ;;  %2976 = vmatpush3.msk.msra.mxu0 %vm690_vm10, %v3520_v32  ;;  %v3241_v46 = vpop.eup %3240  ;;  %vm1270_vm10 = vcmask 130048  }
 0x19f   : > { %3256 = vpow2.f32 %v612_v38  ;;  %2977 = vmatprep.subr.msk.mxu0 %vm689_vm11, %v3520_v32  ;;  %v3243_v59 = vpop.eup %3242  ;;  %v647_v0 = vadd.f32 1.0, %v3241_v46  ;;  %v1033_v38 = vmul.u32 4, %v3866_v37 }
 0x1a0   : > { %3258 = vrcp.f32 %v650_v45  ;;  %2978 = vmatpush3.msk.msra.mxu0 %vm689_vm11, %v3520_v32  ;;  %v3245_v1 = vpop.eup %3244  ;;  %v646_v60 = vadd.f32 1.0, %v3243_v59 }
 0x1a1   : > { %3260 = vpow2.f32 %v610_v43  ;;  %2979 = vmatprep.subr.msk.mxu0 %vm688_vm12, %v3520_v32  ;;  %v3247_v4 = vpop.eup %3246  ;;  %v645_v57 = vadd.f32 1.0, %v3245_v1  ;;  %v1035_v39 = vsub.s32 %v3701_v29, %v1033_v38 }
 0x1a2   : > { %3262 = vrcp.f32 %v649_v44  ;;  %2980 = vmatpush3.msk.msra.mxu0 %vm688_vm12, %v3520_v32  ;;  %v3249_v5 = vpop.eup %3248  ;;  %v644_v58 = vadd.f32 1.0, %v3247_v4 }
 0x1a3   : > { %3264 = vpow2.f32 %v608_v61  ;;  %2981 = vmatprep.subr.msk.mxu0 %vm687_vm13, %v3520_v32  ;;  %v3251_v6 = vpop.eup %3250  ;;  %v643_v8 = vadd.f32 1.0, %v3249_v5  ;;  %vm1037_vm1 = vcmp.ge.s32.totalorder %v1035_v39, 0  ;;  %vm1039_vm2 = vcmp.lt.s32.totalorder %v1035_v39, 4 }
 0x1a4   : > { %3266 = vrcp.f32 %v648_v62  ;;  %2982 = vmatpush3.msk.msra.mxu0 %vm687_vm13, %v3520_v32  ;;  %v3253_v7 = vpop.eup %3252  ;;  %v642_v10 = vadd.f32 1.0, %v3251_v6  ;;  %vm1041_vm3 = vmand %vm1037_vm1, %vm1039_vm2 }
 0x1a5   : > { %3268 = vpow2.f32 %v606_v63  ;;  %2983 = vmatprep.subr.msk.mxu0 %vm686_vm14, %v3520_v32  ;;  %v641_v12 = vadd.f32 1.0, %v3253_v7 }
 0x1a6   : > { %3270 = vrcp.f32 %v647_v0  ;;  %2984 = vmatpush3.msk.msra.mxu0 %vm686_vm14, %v3520_v32 }
 0x1a7   : > { %3272 = vpow2.f32 %v604_v2  ;;  %2985 = vmatprep.subr.msk.mxu0 %vm685_vm15, %v3520_v32 }
 0x1a8   : > { %3274 = vrcp.f32 %v646_v60  ;;  %2986 = vmatpush3.msk.msra.mxu0 %vm685_vm15, %v3520_v32 }
 0x1a9   : > { %2987 = vmatprep.subr.msk.mxu0 %vm684_vm0, %v3520_v32  ;;  %3276 = vrcp.f32 %v645_v57 }
 0x1aa   : > { %2988 = vmatpush3.msk.msra.mxu0 %vm684_vm0, %v3520_v32  ;;  %3278 = vrcp.f32 %v644_v58 }
 0x1ab   : > { %v3255_v55 = vpop.eup %3254  ;;  %2990 = vmatmul.mubr.f32.vlgmr.msra.gmra.mxu0 %v3737_v48  ;;  %3280 = vrcp.f32 %v643_v8 }
 0x1ac   : > { %v3257_v9 = vpop.eup %3256  ;;  %2913 = vmatprep.subr.mxu1 %v3255_v55  ;;  %2992 = vmatprep.mubr.f32.mxu0 %v3741_v49  ;;  %3282 = vrcp.f32 %v642_v10  ;;  %v3898_v10 = vadd.s32 8, %v3866_v37 }
 0x1ad   : > { %v3259_v56 = vpop.eup %3258  ;;  %2914 = vmatpush3.msra.mxu1 %v3255_v55  ;;  %v640_v14 = vadd.f32 1.0, %v3257_v9  ;;  %3284 = vrcp.f32 %v641_v12 }
 0x1ae   : > { %v3261_v11 = vpop.eup %3260  ;;  %2915 = vmatprep.subr.mxu1 %v3259_v56  ;;  %v1034_v12 = vmul.u32 4, %v3898_v10 }
 0x1af   : > { %v3263_v13 = vpop.eup %3262  ;;  %2916 = vmatpush3.msra.mxu1 %v3259_v56  ;;  %2993 = vmatmul.mubr.f32.gmra.mxu0 %v3745_v50  ;;  %v639_v17 = vadd.f32 1.0, %v3261_v11  ;;  %3286 = vrcp.f32 %v640_v14 }
 0x1b0   : > { %v3265_v32 = vpop.eup %3264  ;;  %2917 = vmatprep.subr.mxu1 %v3263_v13  ;;  %2995 = vmatprep.mubr.f32.mxu0 %v3749_v51 }
 0x1b1   : > { %v3267_v15 = vpop.eup %3266  ;;  %2918 = vmatpush3.msra.mxu1 %v3263_v13  ;;  %v638_v20 = vadd.f32 1.0, %v3265_v32  ;;  %3288 = vrcp.f32 %v639_v17 }
 0x1b2   : > { %v3269_v16 = vpop.eup %3268  ;;  %2919 = vmatprep.subr.mxu1 %v3267_v15 }
 0x1b3   : > { %v3271_v18 = vpop.eup %3270  ;;  %2920 = vmatpush3.msra.mxu1 %v3267_v15  ;;  %2996 = vmatmul.mubr.f32.gmra.mxu0 %v3753_v52  ;;  %v637_v22 = vadd.f32 1.0, %v3269_v16  ;;  %3290 = vrcp.f32 %v638_v20  ;;  %v1036_v15 = vsub.s32 %v3701_v29, %v1034_v12 }
 0x1b4   : > { %v3273_v19 = vpop.eup %3272  ;;  %2921 = vmatprep.subr.mxu1 %v3271_v18  ;;  %2998 = vmatprep.mubr.f32.mxu0 %v3757_v53 }
 0x1b5   : > { %v3275_v21 = vpop.eup %3274  ;;  %2922 = vmatpush3.msra.mxu1 %v3271_v18  ;;  %v636_v24 = vadd.f32 1.0, %v3273_v19  ;;  %3292 = vrcp.f32 %v637_v22  ;;  %vm1038_vm5 = vcmp.ge.s32.totalorder %v1036_v15, 0  ;;  %vm1040_vm6 = vcmp.lt.s32.totalorder %v1036_v15, 4 }
 0x1b6   : > { %2923 = vmatprep.subr.mxu1 %v3275_v21  ;;  %v3277_v23 = vpop.eup %3276  ;;  %vm1042_vm7 = vmand %vm1038_vm5, %vm1040_vm6 }
 0x1b7   : > { %2924 = vmatpush3.msra.mxu1 %v3275_v21  ;;  %2999 = vmatmul.mubr.f32.gmra.mxu0 %v3761_v54  ;;  %v3279_v25 = vpop.eup %3278  ;;  %3294 = vrcp.f32 %v636_v24 }
 0x1b8   : > { %2925 = vmatprep.subr.mxu1 %v3277_v23  ;;  %v3281_v26 = vpop.eup %3280 }
 0x1b9   : > { %2926 = vmatpush3.msra.mxu1 %v3277_v23  ;;  %v3283_v27 = vpop.eup %3282 }
 0x1ba   : > { %2927 = vmatprep.subr.mxu1 %v3279_v25  ;;  %v3285_v30 = vpop.eup %3284 }
 0x1bb   : > { %2928 = vmatpush3.msra.mxu1 %v3279_v25 }
 0x1bc   : > { %2929 = vmatprep.subr.mxu1 %v3281_v26  ;;  %v3287_v31 = vpop.eup %3286 }
 0x1bd   : > { %2930 = vmatpush3.msra.mxu1 %v3281_v26 }
 0x1be   : > { %2931 = vmatprep.subr.mxu1 %v3283_v27  ;;  %v3289_v33 = vpop.eup %3288 }
 0x1bf   : > { %2932 = vmatpush3.msra.mxu1 %v3283_v27 }
 0x1c0   : > { %2933 = vmatprep.subr.mxu1 %v3285_v30  ;;  %v3291_v34 = vpop.eup %3290 }
 0x1c1   : > { %2934 = vmatpush3.msra.mxu1 %v3285_v30 }
 0x1c2   : > { %2935 = vmatprep.subr.mxu1 %v3287_v31  ;;  %v3293_v35 = vpop.eup %3292 }
 0x1c3   : > { %2936 = vmatpush3.msra.mxu1 %v3287_v31 }
 0x1c4   : > { %2937 = vmatprep.subr.mxu1 %v3289_v33  ;;  %v3295_v36 = vpop.eup %3294 }
 0x1c5   : > { %2938 = vmatpush3.msra.mxu1 %v3289_v33 }
 0x1c6   : > { %2939 = vmatprep.subr.mxu1 %v3291_v34 }
 0x1c7   : > { %2940 = vmatpush3.msra.mxu1 %v3291_v34 }
 0x1c8   : > { %2941 = vmatprep.subr.mxu1 %v3293_v35 }
 0x1c9   : > { %2942 = vmatpush3.msra.mxu1 %v3293_v35 }
 0x1ca   : > { %2943 = vmatprep.subr.mxu1 %v3295_v36 }
 0x1cb   : > { %2944 = vmatpush3.msra.mxu1 %v3295_v36 }
 0x1cc   : > { %2946 = vmatmul.mubr.f32.vlgmr.msra.gmra.mxu1 %v3737_v48  ;;  %v3521_v48 = vmov 0.0  }
 0x1cd   : > { %2948 = vmatprep.mubr.f32.mxu1 %v3741_v49  ;;  %v2565_v49 = vsel %vm1041_vm3, 1.0, %v3521_v48  ;;  %v2566_v26 = vsel %vm1042_vm7, 1.0, %v3521_v48 }
 0x1ce   : > { %3036 = vmatprep.mubr.msk.f32.mxu0 %vm1102_vm4, %v2565_v49 }
 0x1d0   : > { %2949 = vmatmul.mubr.f32.gmra.mxu1 %v3745_v50 }
 0x1d1   : > { %2951 = vmatprep.mubr.f32.mxu1 %v3749_v51  ;;  %v3873_v51 = vpop.permute.xlu0 %785 }
 0x1d4   : > { %2952 = vmatmul.mubr.f32.gmra.mxu1 %v3753_v52  ;;  %v3875_v52 = vpop.permute.xlu1 %780 }
 0x1d5   : > { %2954 = vmatprep.mubr.f32.mxu1 %v3757_v53  ;;  %v3877_v40 = vpop.permute.xlu0 %775 }
 0x1d8   : > { %2955 = vmatmul.mubr.f32.gmra.mxu1 %v3761_v54  ;;  %v3879_v42 = vpop.permute.xlu1 %770 }
 0x1d9   : > { %3017 = vmatprep.mubr.msk.f32.mxu1 %vm1102_vm4, %v2565_v49  ;;  %v3883_v47 = vpop.permute.xlu0 %765 }
 0x1dc   : > { %v3887_v0 = vpop.permute.xlu1 %760 }
 0x1dd   : > { %v3891_v5 = vpop.permute.xlu0 %755 }
 0x1e0   : > { %v3894_v7 = vpop.permute.xlu1 %750 }
 0x26b   : > { %v2991_v50 = vpop.f32.mrf.mxu0 }
 0x26c   : > { %v981_v58 = vadd.f32 %v2991_v50, %v3891_v5 }
 0x26d   : > { %v975_v28 = vpop.f32.mrf.mxu0 }
 0x26e   : > { %v976_v8 = vadd.f32 %v975_v28, %v3894_v7  ;;  %v1016_v9 = vmul.f32 1.442695, %v981_v58  ;;  %v1048_v58 = vadd.s32 24, %v3866_v37 }
 0x26f   : > { %v2994_v53 = vpop.f32.mrf.mxu0 }
 0x270   : > { %v991_v1 = vadd.f32 %v2994_v53, %v3883_v47  ;;  %v1014_v56 = vmul.f32 1.442695, %v976_v8  ;;  %v1049_v8 = vadd.s32 32, %v3866_v37 }
 0x271   : > { %v985_v54 = vpop.f32.mrf.mxu0 }
 0x272   : > { %v986_v4 = vadd.f32 %v985_v54, %v3887_v0  ;;  %v1020_v6 = vmul.f32 1.442695, %v991_v1  ;;  %v1438_v1 = vpop.trf.xlu0 }
 0x273   : > { %v2997_v41 = vpop.f32.mrf.mxu0 }
 0x274   : > { %v1001_v45 = vadd.f32 %v2997_v41, %v3877_v40  ;;  %v1018_v55 = vmul.f32 1.442695, %v986_v4 }
 0x275   : > { %v995_v43 = vpop.f32.mrf.mxu0 }
 0x276   : > { %v996_v62 = vadd.f32 %v995_v43, %v3879_v42  ;;  %v1024_v2 = vmul.f32 1.442695, %v1001_v45 }
 0x277   : > { %v3000_v44 = vpop.f32.mrf.mxu0 }
 0x278   : > { %v1011_v46 = vadd.f32 %v3000_v44, %v3873_v51  ;;  %v1022_v57 = vmul.f32 1.442695, %v996_v62 }
 0x279   : > { %v1005_v61 = vpop.f32.mrf.mxu0 }
 0x27a   : > { %v1028_v59 = vmul.f32 1.442695, %v1011_v46  ;;  %v1006_v63 = vadd.f32 %v1005_v61, %v3875_v52 }
 0x27c   : > { %3296 = vpow2.f32 %v1028_v59  ;;  %v1026_v60 = vmul.f32 1.442695, %v1006_v63  ;;  %v3946_v59 = vmul.u32 4, %v3701_v29 }
 0x27e   : > { %3298 = vpow2.f32 %v1026_v60  ;;  %v1054_v63 = vsub.s32 %v3866_v37, %v3946_v59  ;;  %v1058_v12 = vsub.s32 %v1049_v8, %v3946_v59 }
 0x27f   : > { %3300 = vpow2.f32 %v1024_v2 }
 0x280   : > { %3302 = vpow2.f32 %v1022_v57  ;;  %vm1062_vm8 = vcmp.ge.s32.totalorder %v1054_v63, 0  ;;  %vm1070_vm9 = vcmp.lt.s32.totalorder %v1054_v63, 4  ;;  %vm1066_vm5 = vcmp.ge.s32.totalorder %v1058_v12, 0 }
 0x281   : > { %3304 = vpow2.f32 %v1020_v6  ;;  %vm1078_vm11 = vmand %vm1062_vm8, %vm1070_vm9  ;;  %v1055_v6 = vsub.s32 %v3898_v10, %v3946_v59  ;;  %vm1074_vm6 = vcmp.lt.s32.totalorder %v1058_v12, 4 }
 0x282   : > { %3306 = vpow2.f32 %v1018_v55  ;;  %vm1082_vm8 = vmand %vm1066_vm5, %vm1074_vm6 }
 0x283   : > { %3308 = vpow2.f32 %v1016_v9  ;;  %v1057_v9 = vsub.s32 %v1048_v58, %v3946_v59  ;;  %vm1063_vm12 = vcmp.ge.s32.totalorder %v1055_v6, 0  ;;  %vm1071_vm13 = vcmp.lt.s32.totalorder %v1055_v6, 4 }
 0x284   : > { %3310 = vpow2.f32 %v1014_v56  ;;  %v1050_v56 = vadd.s32 40, %v3866_v37  ;;  %vm3963_vm0 = vmand %vm1063_vm12, %vm1071_vm13 }
 0x285   : > { %vm1065_vm1 = vcmp.ge.s32.totalorder %v1057_v9, 0  ;;  %vm1073_vm2 = vcmp.lt.s32.totalorder %v1057_v9, 4 }
 0x286   : > { %vm1081_vm7 = vmand %vm1065_vm1, %vm1073_vm2 }
 0x289   : > { %v3297_v11 = vpop.eup %3296 }
 0x28a   : > { %3020 = vmatprep.subr.mxu0 %v3297_v11 }
 0x28b   : > { %v3299_v13 = vpop.eup %3298  ;;  %3021 = vmatpush3.msra.mxu0 %v3297_v11 }
 0x28c   : > { %v2947_v32 = vpop.f32.mrf.mxu1  ;;  %3022 = vmatprep.subr.mxu0 %v3299_v13  ;;  %v3301_v14 = vpop.eup %3300 }
 0x28d   : > { %3023 = vmatpush3.msra.mxu0 %v3299_v13  ;;  %v3303_v17 = vpop.eup %3302  ;;  %v1051_v13 = vadd.s32 48, %v3866_v37 }
 0x28e   : > { %v854_v16 = vpop.f32.mrf.mxu1  ;;  %3024 = vmatprep.subr.mxu0 %v3301_v14  ;;  %v3305_v19 = vpop.eup %3304 }
 0x28f   : > { %3025 = vmatpush3.msra.mxu0 %v3301_v14  ;;  %v3307_v21 = vpop.eup %3306  ;;  %v855_v54 = vadd.f32 %v854_v16, %v3894_v7 }
 0x290   : > { %v2950_v18 = vpop.f32.mrf.mxu1  ;;  %3026 = vmatprep.subr.mxu0 %v3303_v17  ;;  %v3309_v23 = vpop.eup %3308 }
 0x291   : > { %3027 = vmatpush3.msra.mxu0 %v3303_v17  ;;  %v3311_v25 = vpop.eup %3310  ;;  %v870_v38 = vadd.f32 %v2950_v18, %v3883_v47  ;;  %v1059_v18 = vsub.s32 %v1050_v56, %v3946_v59 }
 0x292   : > { %v864_v20 = vpop.f32.mrf.mxu1  ;;  %3028 = vmatprep.subr.mxu0 %v3305_v19 }
 0x293   : > { %3029 = vmatpush3.msra.mxu0 %v3305_v19  ;;  %v865_v50 = vadd.f32 %v864_v20, %v3887_v0  ;;  %v899_v53 = vmul.f32 1.442695, %v870_v38  ;;  %v2567_v0 = vsel %vm1078_vm11, 1.0, %v3521_v48  ;;  %v1052_v19 = vadd.s32 56, %v3866_v37 }
 0x294   : > { %v2953_v22 = vpop.f32.mrf.mxu1  ;;  %3030 = vmatprep.subr.mxu0 %v3307_v21  ;;  %vm1067_vm9 = vcmp.ge.s32.totalorder %v1059_v18, 0  ;;  %vm1075_vm11 = vcmp.lt.s32.totalorder %v1059_v18, 4 }
 0x295   : > { %3031 = vmatpush3.msra.mxu0 %v3307_v21  ;;  %v880_v30 = vadd.f32 %v2953_v22, %v3877_v40  ;;  %v897_v40 = vmul.f32 1.442695, %v865_v50  ;;  %v1060_v21 = vsub.s32 %v1051_v13, %v3946_v59 }
 0x296   : > { %v874_v24 = vpop.f32.mrf.mxu1  ;;  %3032 = vmatprep.subr.mxu0 %v3309_v23 }
 0x297   : > { %3033 = vmatpush3.msra.mxu0 %v3309_v23  ;;  %v875_v34 = vadd.f32 %v874_v24, %v3879_v42  ;;  %v903_v39 = vmul.f32 1.442695, %v880_v30  ;;  %vm1068_vm12 = vcmp.ge.s32.totalorder %v1060_v21, 0  ;;  %vm1076_vm13 = vcmp.lt.s32.totalorder %v1060_v21, 4 }
 0x298   : > { %v2956_v27 = vpop.f32.mrf.mxu1  ;;  %3034 = vmatprep.subr.mxu0 %v3311_v25 }
 0x299   : > { %v890_v31 = vadd.f32 %v2956_v27, %v3873_v51  ;;  %3035 = vmatpush3.msra.mxu0 %v3311_v25  ;;  %v901_v28 = vmul.f32 1.442695, %v875_v34  ;;  %v860_v51 = vadd.f32 %v2947_v32, %v3891_v5  ;;  %v1047_v5 = vadd.s32 16, %v3866_v37 }
 0x29a   : > { %v884_v33 = vpop.f32.mrf.mxu1  ;;  %3037 = vmatmul.mubr.msk.f32.vlgmr.msra.gmra.mxu0 %vm1102_vm4, %v2566_v26  ;;  %v2568_v25 = vsel %vm3963_vm0, 1.0, %v3521_v48  ;;  %v1061_v27 = vsub.s32 %v1052_v19, %v3946_v59 }
 0x29b   : > { %v907_v35 = vmul.f32 1.442695, %v890_v31  ;;  %v885_v36 = vadd.f32 %v884_v33, %v3875_v52  ;;  %v895_v41 = vmul.f32 1.442695, %v860_v51  ;;  %v893_v52 = vmul.f32 1.442695, %v855_v54  ;;  %3071 = vmatprep.mubr.msk.f32.mxu0 %vm1102_vm4, %v1438_v1 }
 0x29c   : > { %v1056_v7 = vsub.s32 %v1047_v5, %v3946_v59  ;;  %v2570_v33 = vsel %vm1081_vm7, 1.0, %v3521_v48  ;;  %vm1069_vm0 = vcmp.ge.s32.totalorder %v1061_v27, 0  ;;  %vm1077_vm1 = vcmp.lt.s32.totalorder %v1061_v27, 4  ;;  %v1259_v54 = vld [vmem:[%s3660_s14] sm:$0x1] }
 0x29d   : > { %3312 = vpow2.f32 %v907_v35  ;;  %v905_v49 = vmul.f32 1.442695, %v885_v36  ;;  %v2571_v35 = vsel %vm1082_vm8, 1.0, %v3521_v48  ;;  %vm1085_vm2 = vmand %vm1069_vm0, %vm1077_vm1 }
 0x29e   : > { %vm1064_vm14 = vcmp.ge.s32.totalorder %v1056_v7, 0  ;;  %vm1072_vm15 = vcmp.lt.s32.totalorder %v1056_v7, 4 }
 0x29f   : > { %3314 = vpow2.f32 %v905_v49  ;;  %vm1080_vm3 = vmand %vm1064_vm14, %vm1072_vm15 }
 0x2a0   : > { %3316 = vpow2.f32 %v903_v39  ;;  %vm1083_vm14 = vmand %vm1067_vm9, %vm1075_vm11 }
 0x2a1   : > { %3318 = vpow2.f32 %v901_v28  ;;  %vm1084_vm15 = vmand %vm1068_vm12, %vm1076_vm13  ;;  %v2572_v38 = vsel %vm1083_vm14, 1.0, %v3521_v48  ;;  %v2574_v28 = vsel %vm1085_vm2, 1.0, %v3521_v48 }
 0x2a2   : > { %3320 = vpow2.f32 %v899_v53  ;;  %v2573_v49 = vsel %vm1084_vm15, 1.0, %v3521_v48 }
 0x2a3   : > { %3322 = vpow2.f32 %v897_v40 }
 0x2a4   : > { %3324 = vpow2.f32 %v895_v41 }
 0x2a5   : > { %3326 = vpow2.f32 %v893_v52  ;;  %v1439_v52 = vpop.trf.xlu0 }
 0x2a9   : > { %v1440_v59 = vpop.trf.xlu0 }
 0x2aa   : > { %v3912_v42 = vpop.eup %3312 }
 0x2ab   : > { %3001 = vmatprep.subr.mxu1 %v3912_v42 }
 0x2ac   : > { %v3915_v43 = vpop.eup %3314  ;;  %3002 = vmatpush3.msra.mxu1 %v3912_v42 }
 0x2ad   : > { %3003 = vmatprep.subr.mxu1 %v3915_v43  ;;  %v3919_v44 = vpop.eup %3316  ;;  %v3994_v63 = vpop.trf.xlu0 }
 0x2ae   : > { %3004 = vmatpush3.msra.mxu1 %v3915_v43  ;;  %v3923_v45 = vpop.eup %3318 }
 0x2af   : > { %3005 = vmatprep.subr.mxu1 %v3919_v44  ;;  %v3927_v46 = vpop.eup %3320 }
 0x2b0   : > { %3006 = vmatpush3.msra.mxu1 %v3919_v44  ;;  %v3931_v47 = vpop.eup %3322 }
 0x2b1   : > { %3007 = vmatprep.subr.mxu1 %v3923_v45  ;;  %v3935_v61 = vpop.eup %3324 }
 0x2b2   : > { %3008 = vmatpush3.msra.mxu1 %v3923_v45  ;;  %v3939_v62 = vpop.eup %3326 }
 0x2b3   : > { %3009 = vmatprep.subr.mxu1 %v3927_v46 }
 0x2b4   : > { %3010 = vmatpush3.msra.mxu1 %v3927_v46 }
 0x2b5   : > { %3011 = vmatprep.subr.mxu1 %v3931_v47 }
 0x2b6   : > { %3012 = vmatpush3.msra.mxu1 %v3931_v47 }
 0x2b7   : > { %3013 = vmatprep.subr.mxu1 %v3935_v61 }
 0x2b8   : > { %3014 = vmatpush3.msra.mxu1 %v3935_v61 }
 0x2b9   : > { %3015 = vmatprep.subr.mxu1 %v3939_v62 }
 0x2ba   : > { %3016 = vmatpush3.msra.mxu1 %v3939_v62 }
 0x2bb   : > { %3018 = vmatmul.mubr.msk.f32.vlgmr.msra.gmra.mxu1 %vm1102_vm4, %v2566_v26  ;;  %v2569_v26 = vsel %vm1080_vm3, 1.0, %v3521_v48  ;;  %vm1281_vm3 = vcmask 122880  }
 0x2bc   : > { %3043 = vmatprep.mubr.msk.f32.mxu1 %vm1270_vm10, %v2567_v0  ;;  %v3996_v0 = vpop.trf.xlu0 }
 0x2c0   : > { %v3998_v1 = vpop.trf.xlu0 }
 0x35a   : > { %v3038_v2 = vpop.f32.mrf.mxu0 }
 0x35b   : > { %3328 = vlog2.f32 %v3038_v2  ;;  %v1444_v2 = vpop.trf.xlu0 }
 0x35c   : > { %v1250_v60 = vpop.f32.mrf.mxu0 }
 0x35d   : > { %3330 = vlog2.f32 %v1250_v60 }
 0x35f   : > { %v1445_v48 = vpop.trf.xlu0 }
 0x368   : > { %v3329_v55 = vpop.eup %3328 }
 0x369   : > { %v1267_v32 = vmul.f32 0.6931472, %v3329_v55 }
 0x36a   : > { %v3331_v11 = vpop.eup %3330 }
 0x36b   : > { %v1265_v17 = vmul.f32 0.6931472, %v3331_v11 }
 0x37b   : > { %v3019_v4 = vpop.f32.mrf.mxu1 }
 0x37c   : > { %3332 = vlog2.f32 %v3019_v4 }
 0x37d   : > { %3334 = vrcp.f32 %v3019_v4  ;;  %v1175_v57 = vpop.f32.mrf.mxu1 }
 0x37e   : > { %3336 = vlog2.f32 %v1175_v57 }
 0x37f   : > { %3338 = vrcp.f32 %v1175_v57  ;;  %v1446_v57 = vpop.trf.xlu0 }
 0x383   : > { %v1447_v7 = vpop.trf.xlu0 }
 0x387   : > { %v1448_v11 = vpop.trf.xlu0 }
 0x389   : > { %v3333_v10 = vpop.eup %3332 }
 0x38a   : > { %v3335_v15 = vpop.eup %3334  ;;  %v1263_v16 = vmul.f32 0.6931472, %v3333_v10 }
 0x38b   : > { %v3337_v20 = vpop.eup %3336  ;;  %3039 = vmatprep.subr.mxu1 %v3335_v15 }
 0x38c   : > { %v3339_v22 = vpop.eup %3338  ;;  %v1269_v23 = vsub.f32 %v1263_v16, %v1267_v32  ;;  %v1261_v24 = vmul.f32 0.6931472, %v3337_v20  ;;  %3040 = vmatpush3.msra.mxu1 %v3335_v15 }
 0x38d   : > { %3041 = vmatprep.subr.mxu1 %v3339_v22 }
 0x38e   : > { %v1268_v37 = vsub.f32 %v1261_v24, %v1265_v17  ;;  %3042 = vmatpush3.msra.mxu1 %v3339_v22  ;;  %v1272_v30 = vsel %vm1270_vm10, %v1269_v23, 0.0 }
 0x38f   : > { %3044 = vmatmul.mubr.msk.f32.vlgmr.msra.gmra.mxu1 %vm1270_vm10, %v2568_v25 }
 0x390   : > { %v1271_v31 = vsel %vm1270_vm10, %v1268_v37, 0.0  ;;  %3046 = vmatprep.mubr.msk.f32.mxu1 %vm1270_vm10, %v2569_v26 }
 0x391   : > { %v1273_v34 = vadd.f32 %v1272_v30, %v1271_v31 }
 0x393   : > { %v1274_v36 = vrot.slane %v1273_v34, 4  ;;  %3047 = vmatmul.mubr.msk.f32.gmra.mxu1 %vm1270_vm10, %v2570_v33 }
 0x394   : > { %3049 = vmatprep.mubr.msk.f32.mxu1 %vm1270_vm10, %v2571_v35 }
 0x395   : > { %v1275_v39 = vadd.f32 %v1274_v36, %v1273_v34 }
 0x397   : > { %v1276_v50 = vrot.slane %v1275_v39, 2  ;;  %3050 = vmatmul.mubr.msk.f32.gmra.mxu1 %vm1270_vm10, %v2572_v38 }
 0x398   : > { %3052 = vmatprep.mubr.msk.f32.mxu1 %vm1270_vm10, %v2573_v49 }
 0x399   : > { %v1277_v51 = vadd.f32 %v1276_v50, %v1275_v39 }
 0x39b   : > { %v1278_v53 = vrot.slane %v1277_v51, 1  ;;  %3053 = vmatmul.mubr.msk.f32.gmra.mxu1 %vm1270_vm10, %v2574_v28 }
 0x39c   : > { %3080 = vmatprep.mubr.msk.f32.mxu1 %vm1102_vm4, %v1444_v2 }
 0x39d   : > { %v1279_v40 = vadd.f32 %v1278_v53, %v1277_v51 }
 0x39f   : > { %v1280_v41 = vadd.f32 %v1279_v40, %v1259_v54 }
 0x3a1   : > { %1282 = vst.msk [vmem:[%s3660_s14] sm:$0x1] %vm1281_vm3, %v1280_v41 }
 0x44f   : > { %v3045_v60 = vpop.f32.mrf.mxu1 }
 0x451   : > { %v1375_v4 = vpop.f32.mrf.mxu1 }
 0x452   : > { %v1414_v14 = vmul.f32 %v3939_v62, %v1375_v4 }
 0x453   : > { %v3048_v5 = vpop.f32.mrf.mxu1 }
 0x454   : > { %v1417_v10 = vmul.f32 %v3927_v46, %v3048_v5 }
 0x455   : > { %v1385_v58 = vpop.f32.mrf.mxu1 }
 0x457   : > { %v3051_v6 = vpop.f32.mrf.mxu1 }
 0x458   : > { %v1419_v13 = vmul.f32 %v3919_v44, %v3051_v6  ;;  %v1415_v44 = vmul.f32 %v3935_v61, %v3045_v60 }
 0x459   : > { %v1395_v8 = vpop.f32.mrf.mxu1 }
 0x45a   : > { %v1418_v32 = vmul.f32 %v3923_v45, %v1395_v8 }
 0x45b   : > { %v3054_v55 = vpop.f32.mrf.mxu1 }
 0x45c   : > { %v1421_v9 = vmul.f32 %v3912_v42, %v3054_v55  ;;  %v1449_v42 = vpop.trf.xlu0 }
 0x45d   : > { %v1405_v56 = vpop.f32.mrf.mxu1 }
 0x45e   : > { %v1420_v12 = vmul.f32 %v3915_v43, %v1405_v56  ;;  %3055 = vmatprep.subr.mxu0 %v1421_v9  ;;  %3130 = vmatprep.subr.mxu1 %v1421_v9  ;;  %v1416_v43 = vmul.f32 %v3931_v47, %v1385_v58 }
 0x45f   : > { %3056 = vmatpush3.msra.mxu0 %v1421_v9  ;;  %3138 = vmatpush3.msra.mxu1 %v1421_v9 }
 0x460   : > { %3057 = vmatprep.subr.mxu0 %v1420_v12  ;;  %3131 = vmatprep.subr.mxu1 %v1420_v12  ;;  %v1450_v45 = vpop.trf.xlu0 }
 0x461   : > { %3058 = vmatpush3.msra.mxu0 %v1420_v12  ;;  %3139 = vmatpush3.msra.mxu1 %v1420_v12 }
 0x462   : > { %3059 = vmatprep.subr.mxu0 %v1419_v13  ;;  %3132 = vmatprep.subr.mxu1 %v1419_v13 }
 0x463   : > { %3060 = vmatpush3.msra.mxu0 %v1419_v13  ;;  %3140 = vmatpush3.msra.mxu1 %v1419_v13 }
 0x464   : > { %3061 = vmatprep.subr.mxu0 %v1418_v32  ;;  %3133 = vmatprep.subr.mxu1 %v1418_v32  ;;  %v1451_v46 = vpop.trf.xlu0 }
 0x465   : > { %3062 = vmatpush3.msra.mxu0 %v1418_v32  ;;  %3141 = vmatpush3.msra.mxu1 %v1418_v32 }
 0x466   : > { %3063 = vmatprep.subr.mxu0 %v1417_v10  ;;  %3134 = vmatprep.subr.mxu1 %v1417_v10 }
 0x467   : > { %3064 = vmatpush3.msra.mxu0 %v1417_v10  ;;  %3142 = vmatpush3.msra.mxu1 %v1417_v10 }
 0x468   : > { %3065 = vmatprep.subr.mxu0 %v1416_v43  ;;  %3135 = vmatprep.subr.mxu1 %v1416_v43  ;;  %v1452_v47 = vpop.trf.xlu0 }
 0x469   : > { %3066 = vmatpush3.msra.mxu0 %v1416_v43  ;;  %3143 = vmatpush3.msra.mxu1 %v1416_v43 }
 0x46a   : > { %3067 = vmatprep.subr.mxu0 %v1415_v44  ;;  %3136 = vmatprep.subr.mxu1 %v1415_v44 }
 0x46b   : > { %3068 = vmatpush3.msra.mxu0 %v1415_v44  ;;  %3144 = vmatpush3.msra.mxu1 %v1415_v44 }
 0x46c   : > { %3069 = vmatprep.subr.mxu0 %v1414_v14  ;;  %3137 = vmatprep.subr.mxu1 %v1414_v14  ;;  %v1453_v61 = vpop.trf.xlu0 }
 0x46d   : > { %3070 = vmatpush3.msra.mxu0 %v1414_v14  ;;  %3145 = vmatpush3.msra.mxu1 %v1414_v14 }
 0x46e   : > { %3072 = vmatmul.mubr.msk.f32.vlgmr.msra.gmra.mxu0 %vm1102_vm4, %v1439_v52  ;;  %3081 = vmatmul.mubr.msk.f32.vlgmr.msra.gmra.mxu1 %vm1102_vm4, %v1445_v48 }
 0x46f   : > { %3074 = vmatprep.mubr.msk.f32.mxu0 %vm1102_vm4, %v1440_v59  ;;  %3083 = vmatprep.mubr.msk.f32.mxu1 %vm1102_vm4, %v1446_v57 }
 0x472   : > { %3075 = vmatmul.mubr.msk.f32.gmra.mxu0 %vm1102_vm4, %v3994_v63  ;;  %3084 = vmatmul.mubr.msk.f32.gmra.mxu1 %vm1102_vm4, %v1447_v7 }
 0x473   : > { %3077 = vmatprep.mubr.msk.f32.mxu0 %vm1102_vm4, %v3996_v0  ;;  %3086 = vmatprep.mubr.msk.f32.mxu1 %vm1102_vm4, %v1448_v11 }
 0x476   : > { %3078 = vmatmul.mubr.msk.f32.gmra.mxu0 %vm1102_vm4, %v3998_v1  ;;  %3087 = vmatmul.mubr.msk.f32.gmra.mxu1 %vm1102_vm4, %v1449_v42 }
 0x477   : > { %3089 = vmatprep.mubr.msk.f32.mxu1 %vm1102_vm4, %v1450_v45 }
 0x47a   : > { %3090 = vmatmul.mubr.msk.f32.gmra.mxu1 %vm1102_vm4, %v1451_v46 }
 0x47b   : > { %3092 = vmatprep.mubr.msk.f32.mxu1 %vm1102_vm4, %v1452_v47 }
 0x47e   : > { %3093 = vmatmul.mubr.msk.f32.gmra.mxu1 %vm1102_vm4, %v1453_v61 }
 0x52e   : > { %v3073_v62 = vpop.f32.mrf.mxu0  ;;  %v3082_v15 = vpop.f32.mrf.mxu1 }
 0x52f   : > { %1649 = vst.msk [vmem:[%s1647_s9 + $0x8] sm:$0xff] %vm1270_vm10, %v3073_v62  ;;  %1655 = vst.msk [vmem:[%s1647_s9 + $0x38] sm:$0xff] %vm1270_vm10, %v3082_v15 }
 0x530   : > { %v1568_v16 = vpop.f32.mrf.mxu0  ;;  %v1598_v17 = vpop.f32.mrf.mxu1 }
 0x531   : > { %1648 = vst.msk [vmem:[%s1647_s9] sm:$0xff] %vm1270_vm10, %v1568_v16  ;;  %1654 = vst.msk [vmem:[%s1647_s9 + $0x30] sm:$0xff] %vm1270_vm10, %v1598_v17 }
 0x532   : > { %v3076_v18 = vpop.f32.mrf.mxu0  ;;  %v3085_v19 = vpop.f32.mrf.mxu1 }
 0x533   : > { %1651 = vst.msk [vmem:[%s1647_s9 + $0x18] sm:$0xff] %vm1270_vm10, %v3076_v18  ;;  %1657 = vst.msk [vmem:[%s1647_s9 + $0x48] sm:$0xff] %vm1270_vm10, %v3085_v19 }
 0x534   : > { %v1578_v20 = vpop.f32.mrf.mxu0  ;;  %v1608_v21 = vpop.f32.mrf.mxu1 }
 0x535   : > { %1650 = vst.msk [vmem:[%s1647_s9 + $0x10] sm:$0xff] %vm1270_vm10, %v1578_v20  ;;  %1656 = vst.msk [vmem:[%s1647_s9 + $0x40] sm:$0xff] %vm1270_vm10, %v1608_v21 }
 0x536   : > { %v3079_v22 = vpop.f32.mrf.mxu0  ;;  %v3088_v23 = vpop.f32.mrf.mxu1 }
 0x537   : > { %1653 = vst.msk [vmem:[%s1647_s9 + $0x28] sm:$0xff] %vm1270_vm10, %v3079_v22  ;;  %1659 = vst.msk [vmem:[%s1647_s9 + $0x58] sm:$0xff] %vm1270_vm10, %v3088_v23 }
 0x538   : > { %v1588_v24 = vpop.f32.mrf.mxu0  ;;  %v1618_v25 = vpop.f32.mrf.mxu1 }
 0x539   : > { %1652 = vst.msk [vmem:[%s1647_s9 + $0x20] sm:$0xff] %vm1270_vm10, %v1588_v24  ;;  %1658 = vst.msk [vmem:[%s1647_s9 + $0x50] sm:$0xff] %vm1270_vm10, %v1618_v25 }
 0x53a   : > { %v3091_v26 = vpop.f32.mrf.mxu1 }
 0x53b   : > { %1661 = vst.msk [vmem:[%s1647_s9 + $0x68] sm:$0xff] %vm1270_vm10, %v3091_v26 }
 0x53c   : > { %v1628_v37 = vpop.f32.mrf.mxu1 }
 0x53d   : > { %1660 = vst.msk [vmem:[%s1647_s9 + $0x60] sm:$0xff] %vm1270_vm10, %v1628_v37  ;;  %1667 = sbr.rel (%p2603_p1) target bundleno = 1811 (0x713), region = 48 }
 0x53e   : > { %v3094_v27 = vpop.f32.mrf.mxu1 }
 0x53f   : > { %1663 = vst.msk [vmem:[%s1647_s9 + $0x78] sm:$0xff] %vm1270_vm10, %v3094_v27 }
 0x540   : > { %v1638_v30 = vpop.f32.mrf.mxu1 }
 0x541   : > { %1662 = vst.msk [vmem:[%s1647_s9 + $0x70] sm:$0xff] %vm1270_vm10, %v1638_v30 }
 0x542   : > { %v1699_v31 = vld [vmem:[%s4390_s1 + $0xf8] sm:$0xff]  ;;  %v1698_v33 = vld [vmem:[%s4390_s1 + $0xf0] sm:$0xff]  ;;  %v3522_v34 = vmov 0   ;;  %v1697_v38 = vld [vmem:[%s4390_s1 + $0xe8] sm:$0xff]  ;;  %v3523_v37 = vmov 1.0  }
 0x543   : > { %3341 = vset.pattern.permute.xlu1 %v3522_v34  ;;  %3340 = vset.pattern.permute.xlu0 %v3522_v34  ;;  %v1683_v35 = vld [vmem:[%s4390_s1 + $0x78] sm:$0xff]  ;;  %v1682_v36 = vld [vmem:[%s4390_s1 + $0x70] sm:$0xff]  ;;  %v1681_v39 = vld [vmem:[%s4390_s1 + $0x68] sm:$0xff] }
 0x544   : > { %1810 = vperm.xlu0 %3340, %v1699_v31   ;;  %1807 = vperm.xlu1 %3341, %v1698_v33   ;;  %v1696_v49 = vld [vmem:[%s4390_s1 + $0xe0] sm:$0xff]  ;;  %v1715_v50 = vld [vmem:[%s4390_s1 + $0x178] sm:$0xff]  ;;  %v1714_v53 = vld [vmem:[%s4390_s1 + $0x170] sm:$0xff] }
 0x545   : > { %v1695_v28 = vld [vmem:[%s4390_s1 + $0xd8] sm:$0xff]  ;;  %v1680_v51 = vld [vmem:[%s4390_s1 + $0x60] sm:$0xff]  ;;  %v1694_v40 = vld [vmem:[%s4390_s1 + $0xd0] sm:$0xff] }
 0x546   : > { %v1679_v54 = vld [vmem:[%s4390_s1 + $0x58] sm:$0xff]  ;;  %v1713_v41 = vld [vmem:[%s4390_s1 + $0x168] sm:$0xff]  ;;  %v1678_v59 = vld [vmem:[%s4390_s1 + $0x50] sm:$0xff] }
 0x547   : > { %v1693_v52 = vld [vmem:[%s4390_s1 + $0xc8] sm:$0xff]  ;;  %v1712_v63 = vld [vmem:[%s4390_s1 + $0x160] sm:$0xff]  ;;  %v1711_v2 = vld [vmem:[%s4390_s1 + $0x158] sm:$0xff] }
 0x548   : > { %1762 = vperm.xlu0 %3340, %v1683_v35   ;;  %1759 = vperm.xlu1 %3341, %v1682_v36   ;;  %v1677_v0 = vld [vmem:[%s4390_s1 + $0x48] sm:$0xff]  ;;  %v1692_v1 = vld [vmem:[%s4390_s1 + $0xc0] sm:$0xff]  ;;  %v1691_v48 = vld [vmem:[%s4390_s1 + $0xb8] sm:$0xff] }
 0x549   : > { %v1676_v60 = vld [vmem:[%s4390_s1 + $0x40] sm:$0xff]  ;;  %v1710_v4 = vld [vmem:[%s4390_s1 + $0x150] sm:$0xff]  ;;  %v1675_v57 = vld [vmem:[%s4390_s1 + $0x38] sm:$0xff] }
 0x54a   : > { %v1690_v5 = vld [vmem:[%s4390_s1 + $0xb0] sm:$0xff]  ;;  %v1709_v58 = vld [vmem:[%s4390_s1 + $0x148] sm:$0xff]  ;;  %v1708_v8 = vld [vmem:[%s4390_s1 + $0x140] sm:$0xff] }
 0x54b   : > { %v1689_v6 = vld [vmem:[%s4390_s1 + $0xa8] sm:$0xff]  ;;  %v1674_v7 = vld [vmem:[%s4390_s1 + $0x30] sm:$0xff]  ;;  %v1688_v9 = vld [vmem:[%s4390_s1 + $0xa0] sm:$0xff] }
 0x54c   : > { %1804 = vperm.xlu0 %3340, %v1697_v38   ;;  %1756 = vperm.xlu1 %3341, %v1681_v39   ;;  %v1673_v55 = vld [vmem:[%s4390_s1 + $0x28] sm:$0xff]  ;;  %v1707_v56 = vld [vmem:[%s4390_s1 + $0x138] sm:$0xff]  ;;  %v1672_v12 = vld [vmem:[%s4390_s1 + $0x20] sm:$0xff] }
 0x54d   : > { %v1687_v11 = vld [vmem:[%s4390_s1 + $0x98] sm:$0xff]  ;;  %v1706_v13 = vld [vmem:[%s4390_s1 + $0x130] sm:$0xff]  ;;  %v1705_v10 = vld [vmem:[%s4390_s1 + $0x128] sm:$0xff] }
 0x54e   : > { %v1671_v32 = vld [vmem:[%s4390_s1 + $0x18] sm:$0xff]  ;;  %v1686_v42 = vld [vmem:[%s4390_s1 + $0x90] sm:$0xff]  ;;  %v1685_v43 = vld [vmem:[%s4390_s1 + $0x88] sm:$0xff] }
 0x54f   : > { %v1670_v44 = vld [vmem:[%s4390_s1 + $0x10] sm:$0xff]  ;;  %v1704_v45 = vld [vmem:[%s4390_s1 + $0x120] sm:$0xff]  ;;  %v1669_v14 = vld [vmem:[%s4390_s1 + $0x8] sm:$0xff] }
 0x550   : > { %1801 = vperm.xlu0 %3340, %v1696_v49   ;;  %1858 = vperm.xlu1 %3341, %v1715_v50   ;;  %v1684_v46 = vld [vmem:[%s4390_s1 + $0x80] sm:$0xff]  ;;  %v1703_v47 = vld [vmem:[%s4390_s1 + $0x118] sm:$0xff]  ;;  %v1702_v61 = vld [vmem:[%s4390_s1 + $0x110] sm:$0xff] }
 0x551   : > { %v1668_v62 = vld [vmem:[%s4390_s1] sm:$0xff]  ;;  %v1701_v16 = vld [vmem:[%s4390_s1 + $0x108] sm:$0xff]  ;;  %v2006_v25 = vld [vmem:[#allocation2 + $0x10] sm:$0xff] }
 0x552   : > { %v1700_v15 = vld [vmem:[%s4390_s1 + $0x100] sm:$0xff]  ;;  %v2005_v20 = vld [vmem:[#allocation2 + $0x8] sm:$0xff]  ;;  %v2022_v26 = vld [vmem:[#allocation2 + $0x90] sm:$0xff] }
 0x553   : > { %v2004_v17 = vld [vmem:[#allocation2] sm:$0xff]  ;;  %v2021_v21 = vld [vmem:[#allocation2 + $0x88] sm:$0xff]  ;;  %v3346_v27 = vpack.i.bf16 %v2006_v25, %v2022_v26  ;;  %v2007_v33 = vld [vmem:[#allocation2 + $0x18] sm:$0xff] }
 0x554   : > { %1798 = vperm.xlu1 %3341, %v1695_v28   ;;  %1753 = vperm.xlu0 %3340, %v1680_v51   ;;  %v2020_v18 = vld [vmem:[#allocation2 + $0x80] sm:$0xff]  ;;  %v3344_v22 = vpack.i.bf16 %v2005_v20, %v2021_v21  ;;  %v2023_v34 = vld [vmem:[#allocation2 + $0x98] sm:$0xff] }
 0x555   : > { %v3342_v19 = vpack.i.bf16 %v2004_v17, %v2020_v18  ;;  %v2036_v35 = vld [vmem:[#allocation2 + $0x100] sm:$0xff]  ;;  %v3348_v36 = vpack.i.bf16 %v2007_v33, %v2023_v34  ;;  %v2015_v17 = vld [vmem:[#allocation2 + $0x58] sm:$0xff]  ;;  %v2033_v33 = vld [vmem:[#allocation2 + $0xe8] sm:$0xff] }
 0x556   : > { %v2008_v49 = vld [vmem:[#allocation2 + $0x20] sm:$0xff]  ;;  %v2031_v18 = vld [vmem:[#allocation2 + $0xd8] sm:$0xff] }
 0x557   : > { %v2024_v50 = vld [vmem:[#allocation2 + $0xa0] sm:$0xff] }
 0x558   : > { %1855 = vperm.xlu0 %3340, %v1714_v53   ;;  %1750 = vperm.xlu1 %3341, %v1679_v54   ;;  %v2037_v53 = vld [vmem:[#allocation2 + $0x108] sm:$0xff]  ;;  %v3350_v54 = vpack.i.bf16 %v2008_v49, %v2024_v50  ;;  %v2044_v21 = vld [vmem:[#allocation2 + $0x140] sm:$0xff]  ;;  %v2034_v49 = vld [vmem:[#allocation2 + $0xf0] sm:$0xff] }
 0x55c   : > { %1795 = vperm.xlu0 %3340, %v1694_v40   ;;  %1852 = vperm.xlu1 %3341, %v1713_v41   ;;  %v2009_v40 = vld [vmem:[#allocation2 + $0x28] sm:$0xff] }
 0x55d   : > { %v2025_v41 = vld [vmem:[#allocation2 + $0xa8] sm:$0xff] }
 0x560   : > { %1792 = vperm.xlu1 %3341, %v1693_v52   ;;  %1747 = vperm.xlu0 %3340, %v1678_v59  }
 0x564   : > { %1849 = vperm.xlu0 %3340, %v1712_v63   ;;  %1744 = vperm.xlu1 %3341, %v1677_v0   ;;  %v2038_v63 = vld [vmem:[#allocation2 + $0x110] sm:$0xff]  ;;  %v3352_v0 = vpack.i.bf16 %v2009_v40, %v2025_v41  ;;  %v2035_v40 = vld [vmem:[#allocation2 + $0xf8] sm:$0xff] }
 0x568   : > { %1789 = vperm.xlu0 %3340, %v1692_v1   ;;  %1846 = vperm.xlu1 %3341, %v1711_v2   ;;  %v2010_v1 = vld [vmem:[#allocation2 + $0x30] sm:$0xff] }
 0x569   : > { %v2026_v2 = vld [vmem:[#allocation2 + $0xb0] sm:$0xff] }
 0x56c   : > { %1786 = vperm.xlu1 %3341, %v1691_v48   ;;  %1741 = vperm.xlu0 %3340, %v1676_v60  }
 0x570   : > { %1843 = vperm.xlu0 %3340, %v1710_v4   ;;  %1738 = vperm.xlu1 %3341, %v1675_v57   ;;  %v2039_v4 = vld [vmem:[#allocation2 + $0x118] sm:$0xff]  ;;  %v3354_v57 = vpack.i.bf16 %v2010_v1, %v2026_v2  ;;  %v2049_v2 = vld [vmem:[#allocation2 + $0x168] sm:$0xff] }
 0x574   : > { %1783 = vperm.xlu0 %3340, %v1690_v5   ;;  %1840 = vperm.xlu1 %3341, %v1709_v58   ;;  %v2011_v5 = vld [vmem:[#allocation2 + $0x38] sm:$0xff] }
 0x575   : > { %v2027_v58 = vld [vmem:[#allocation2 + $0xb8] sm:$0xff] }
 0x578   : > { %1780 = vperm.xlu1 %3341, %v1689_v6   ;;  %1735 = vperm.xlu0 %3340, %v1674_v7  }
 0x57c   : > { %1837 = vperm.xlu0 %3340, %v1708_v8   ;;  %1732 = vperm.xlu1 %3341, %v1673_v55   ;;  %v2040_v8 = vld [vmem:[#allocation2 + $0x120] sm:$0xff]  ;;  %v3356_v55 = vpack.i.bf16 %v2011_v5, %v2027_v58  ;;  %v2051_v58 = vld [vmem:[#allocation2 + $0x178] sm:$0xff] }
 0x580   : > { %1777 = vperm.xlu0 %3340, %v1688_v9   ;;  %1834 = vperm.xlu1 %3341, %v1707_v56   ;;  %v2012_v9 = vld [vmem:[#allocation2 + $0x40] sm:$0xff] }
 0x581   : > { %v2028_v56 = vld [vmem:[#allocation2 + $0xc0] sm:$0xff] }
 0x584   : > { %1774 = vperm.xlu1 %3341, %v1687_v11   ;;  %1729 = vperm.xlu0 %3340, %v1672_v12  }
 0x588   : > { %1831 = vperm.xlu0 %3340, %v1706_v13   ;;  %1726 = vperm.xlu1 %3341, %v1671_v32   ;;  %v2041_v13 = vld [vmem:[#allocation2 + $0x128] sm:$0xff]  ;;  %v3358_v32 = vpack.i.bf16 %v2012_v9, %v2028_v56 }
 0x58c   : > { %1771 = vperm.xlu0 %3340, %v1686_v42   ;;  %1828 = vperm.xlu1 %3341, %v1705_v10   ;;  %v2013_v42 = vld [vmem:[#allocation2 + $0x48] sm:$0xff] }
 0x58d   : > { %v2029_v10 = vld [vmem:[#allocation2 + $0xc8] sm:$0xff] }
 0x590   : > { %1768 = vperm.xlu1 %3341, %v1685_v43   ;;  %1723 = vperm.xlu0 %3340, %v1670_v44  }
 0x594   : > { %1825 = vperm.xlu0 %3340, %v1704_v45   ;;  %1720 = vperm.xlu1 %3341, %v1669_v14   ;;  %v2042_v45 = vld [vmem:[#allocation2 + $0x130] sm:$0xff]  ;;  %v3360_v14 = vpack.i.bf16 %v2013_v42, %v2029_v10 }
 0x598   : > { %1765 = vperm.xlu0 %3340, %v1684_v46   ;;  %1822 = vperm.xlu1 %3341, %v1703_v47   ;;  %v2014_v46 = vld [vmem:[#allocation2 + $0x50] sm:$0xff] }
 0x599   : > { %v2030_v47 = vld [vmem:[#allocation2 + $0xd0] sm:$0xff] }
 0x59c   : > { %1819 = vperm.xlu1 %3341, %v1702_v61   ;;  %1717 = vperm.xlu0 %3340, %v1668_v62  }
 0x5a0   : > { %1813 = vperm.xlu1 %3341, %v1700_v15   ;;  %1816 = vperm.xlu0 %3340, %v1701_v16   ;;  %v2043_v15 = vld [vmem:[#allocation2 + $0x138] sm:$0xff]  ;;  %v3362_v16 = vpack.i.bf16 %v2014_v46, %v2030_v47 }
 0x5be   : > { %3343 = vxpose.xlu0.b32.start [1/16] (narrow) %v3342_v19, 16 }
 0x5bf   : > { %v1811_v23 = vpop.permute.xlu0 %1810  ;;  %v1808_v24 = vpop.permute.xlu1 %1807 }
 0x5c0   : > { %vm1891_vm4 = vcmp.eq.s32.totalorder %v3701_v29, %v1811_v23  ;;  %vm1890_vm5 = vcmp.eq.s32.totalorder %v3701_v29, %v1808_v24  ;;  %v2016_v23 = vld [vmem:[#allocation2 + $0x60] sm:$0xff] }
 0x5c1   : > { %2829 = vmatprep.subr.msk.mxu0 %vm1891_vm4, %v3523_v37  ;;  %v2032_v24 = vld [vmem:[#allocation2 + $0xe0] sm:$0xff] }
 0x5c2   : > { %3345 = vxpose.xlu0.b32.cont [2/16] (narrow) %v3344_v22, 16  ;;  %v3364_v22 = vpack.i.bf16 %v2015_v17, %v2031_v18  ;;  %v2298_v17 = vld [vmem:[%s3647_s0] sm:$0xff] }
 0x5c3   : > { %v1763_v30 = vpop.permute.xlu0 %1762  ;;  %v1760_v31 = vpop.permute.xlu1 %1759 }
 0x5c4   : > { %vm1875_vm10 = vcmp.eq.s32.totalorder %v3701_v29, %v1763_v30  ;;  %vm1874_vm6 = vcmp.eq.s32.totalorder %v3701_v29, %v1760_v31  ;;  %v3366_v30 = vpack.i.bf16 %v2016_v23, %v2032_v24  ;;  %v2017_v31 = vld [vmem:[#allocation2 + $0x68] sm:$0xff] }
 0x5c5   : > { %2830 = vmatpush3.msk.msra.mxu0 %vm1875_vm10, %v3523_v37 }
 0x5c6   : > { %2831 = vmatprep.subr.msk.mxu0 %vm1890_vm5, %v3523_v37  ;;  %3347 = vxpose.xlu0.b32.cont [3/16] (narrow) %v3346_v27, 16  ;;  %v2045_v27 = vld [vmem:[#allocation2 + $0x148] sm:$0xff] }
 0x5c7   : > { %v1805_v38 = vpop.permute.xlu0 %1804  ;;  %2832 = vmatpush3.msk.msra.mxu0 %vm1874_vm6, %v3523_v37  ;;  %v1757_v39 = vpop.permute.xlu1 %1756 }
 0x5c8   : > { %vm1889_vm7 = vcmp.eq.s32.totalorder %v3701_v29, %v1805_v38  ;;  %vm1873_vm8 = vcmp.eq.s32.totalorder %v3701_v29, %v1757_v39  ;;  %v3368_v38 = vpack.i.bf16 %v2017_v31, %v2033_v33  ;;  %v2018_v39 = vld [vmem:[#allocation2 + $0x70] sm:$0xff]  ;;  %v2312_v33 = vstv %s3641_s18 }
 0x5c9   : > { %2833 = vmatprep.subr.msk.mxu0 %vm1889_vm7, %v3523_v37  ;;  %2116 = vxpose.xlu1.b32.start [1/16] (narrow) %v2036_v35, 16 }
 0x5ca   : > { %2834 = vmatpush3.msk.msra.mxu0 %vm1873_vm8, %v3523_v37  ;;  %3349 = vxpose.xlu0.b32.cont [4/16] (narrow) %v3348_v36, 16  ;;  %v2046_v36 = vld [vmem:[#allocation2 + $0x150] sm:$0xff] }
 0x5cb   : > { %v1802_v28 = vpop.permute.xlu0 %1801  ;;  %v1859_v51 = vpop.permute.xlu1 %1858 }
 0x5cc   : > { %vm1888_vm9 = vcmp.eq.s32.totalorder %v3701_v29, %v1802_v28  ;;  %vm1907_vm11 = vcmp.eq.s32.totalorder %v3701_v29, %v1859_v51  ;;  %v2047_v51 = vld [vmem:[#allocation2 + $0x158] sm:$0xff] }
 0x5cd   : > { %2835 = vmatprep.subr.msk.mxu0 %vm1888_vm9, %v3523_v37  ;;  %3095 = vmatprep.subr.msk.mxu1 %vm1907_vm11, %v3523_v37 }
 0x5ce   : > { %2117 = vxpose.xlu1.b32.cont [2/16] (narrow) %v2037_v53, 16  ;;  %3096 = vmatpush3.msk.msra.mxu1 %vm1907_vm11, %v3523_v37  ;;  %v3370_v53 = vpack.i.bf16 %v2018_v39, %v2034_v49 }
 0x5cf   : > { %v1799_v52 = vpop.permute.xlu1 %1798  ;;  %v1754_v59 = vpop.permute.xlu0 %1753  ;;  %3351 = vxpose.xlu0.b32.cont [5/16] (narrow) %v3350_v54, 16  ;;  %v2019_v54 = vld [vmem:[#allocation2 + $0x78] sm:$0xff] }
 0x5d0   : > { %vm1887_vm12 = vcmp.eq.s32.totalorder %v3701_v29, %v1799_v52  ;;  %vm1872_vm13 = vcmp.eq.s32.totalorder %v3701_v29, %v1754_v59  ;;  %v2048_v59 = vld [vmem:[#allocation2 + $0x160] sm:$0xff] }
 0x5d1   : > { %2836 = vmatpush3.msk.msra.mxu0 %vm1872_vm13, %v3523_v37 }
 0x5d2   : > { %2118 = vxpose.xlu1.b32.cont [3/16] (narrow) %v2038_v63, 16  ;;  %2837 = vmatprep.subr.msk.mxu0 %vm1887_vm12, %v3523_v37  ;;  %v3372_v63 = vpack.i.bf16 %v2019_v54, %v2035_v40 }
 0x5d3   : > { %v1856_v48 = vpop.permute.xlu0 %1855  ;;  %v1751_v60 = vpop.permute.xlu1 %1750  ;;  %3353 = vxpose.xlu0.b32.cont [6/16] (narrow) %v3352_v0, 16 }
 0x5d4   : > { %vm1906_vm14 = vcmp.eq.s32.totalorder %v3701_v29, %v1856_v48  ;;  %vm1871_vm15 = vcmp.eq.s32.totalorder %v3701_v29, %v1751_v60 }
 0x5d5   : > { %2838 = vmatpush3.msk.msra.mxu0 %vm1871_vm15, %v3523_v37  ;;  %3097 = vmatprep.subr.msk.mxu1 %vm1906_vm14, %v3523_v37 }
 0x5d6   : > { %2119 = vxpose.xlu1.b32.cont [4/16] (narrow) %v2039_v4, 16  ;;  %3098 = vmatpush3.msk.msra.mxu1 %vm1906_vm14, %v3523_v37  ;;  %v2050_v4 = vld [vmem:[#allocation2 + $0x170] sm:$0xff] }
 0x5d7   : > { %v1796_v6 = vpop.permute.xlu0 %1795  ;;  %v1853_v7 = vpop.permute.xlu1 %1852  ;;  %3355 = vxpose.xlu0.b32.cont [7/16] (narrow) %v3354_v57, 16 }
 0x5d8   : > { %vm1886_vm0 = vcmp.eq.s32.totalorder %v3701_v29, %v1796_v6  ;;  %vm1905_vm1 = vcmp.eq.s32.totalorder %v3701_v29, %v1853_v7 }
 0x5d9   : > { %2839 = vmatprep.subr.msk.mxu0 %vm1886_vm0, %v3523_v37  ;;  %3099 = vmatprep.subr.msk.mxu1 %vm1905_vm1, %v3523_v37 }
 0x5da   : > { %2120 = vxpose.xlu1.b32.cont [5/16] (narrow) %v2040_v8, 16  ;;  %3100 = vmatpush3.msk.msra.mxu1 %vm1905_vm1, %v3523_v37 }
 0x5db   : > { %v1793_v11 = vpop.permute.xlu1 %1792  ;;  %v1748_v12 = vpop.permute.xlu0 %1747  ;;  %3357 = vxpose.xlu0.b32.cont [8/16] (narrow) %v3356_v55, 16 }
 0x5dc   : > { %vm1885_vm2 = vcmp.eq.s32.totalorder %v3701_v29, %v1793_v11  ;;  %vm1870_vm4 = vcmp.eq.s32.totalorder %v3701_v29, %v1748_v12 }
 0x5dd   : > { %2840 = vmatpush3.msk.msra.mxu0 %vm1870_vm4, %v3523_v37 }
 0x5de   : > { %2121 = vxpose.xlu1.b32.cont [6/16] (narrow) %v2041_v13, 16  ;;  %2841 = vmatprep.subr.msk.mxu0 %vm1885_vm2, %v3523_v37 }
 0x5df   : > { %v1850_v43 = vpop.permute.xlu0 %1849  ;;  %v1745_v44 = vpop.permute.xlu1 %1744  ;;  %3359 = vxpose.xlu0.b32.cont [9/16] (narrow) %v3358_v32, 16 }
 0x5e0   : > { %vm1904_vm10 = vcmp.eq.s32.totalorder %v3701_v29, %v1850_v43  ;;  %vm1869_vm5 = vcmp.eq.s32.totalorder %v3701_v29, %v1745_v44 }
 0x5e1   : > { %2842 = vmatpush3.msk.msra.mxu0 %vm1869_vm5, %v3523_v37  ;;  %3101 = vmatprep.subr.msk.mxu1 %vm1904_vm10, %v3523_v37 }
 0x5e2   : > { %2122 = vxpose.xlu1.b32.cont [7/16] (narrow) %v2042_v45, 16  ;;  %3102 = vmatpush3.msk.msra.mxu1 %vm1904_vm10, %v3523_v37 }
 0x5e3   : > { %v1790_v61 = vpop.permute.xlu0 %1789  ;;  %v1847_v62 = vpop.permute.xlu1 %1846  ;;  %3361 = vxpose.xlu0.b32.cont [10/16] (narrow) %v3360_v14, 16 }
 0x5e4   : > { %vm1884_vm6 = vcmp.eq.s32.totalorder %v3701_v29, %v1790_v61  ;;  %vm1903_vm7 = vcmp.eq.s32.totalorder %v3701_v29, %v1847_v62  ;;  %v2323_v62 = vld [vmem:[%s3660_s14] sm:$0x1] }
 0x5e5   : > { %2843 = vmatprep.subr.msk.mxu0 %vm1884_vm6, %v3523_v37  ;;  %3103 = vmatprep.subr.msk.mxu1 %vm1903_vm7, %v3523_v37 }
 0x5e6   : > { %2123 = vxpose.xlu1.b32.cont [8/16] (narrow) %v2043_v15, 16  ;;  %3104 = vmatpush3.msk.msra.mxu1 %vm1903_vm7, %v3523_v37  ;;  %v2324_v15 = vmul.f32 1.442695, %v2323_v62 }
 0x5e7   : > { %v1787_v19 = vpop.permute.xlu1 %1786  ;;  %v1742_v20 = vpop.permute.xlu0 %1741  ;;  %3363 = vxpose.xlu0.b32.cont [11/16] (narrow) %v3362_v16, 16  ;;  %v2299_v16 = vld [vmem:[%s3647_s0 + $0x8] sm:$0xff] }
 0x5e8   : > { %vm1883_vm8 = vcmp.eq.s32.totalorder %v3701_v29, %v1787_v19  ;;  %vm1868_vm9 = vcmp.eq.s32.totalorder %v3701_v29, %v1742_v20  ;;  %3384 = vpow2.f32 %v2324_v15  ;;  %v2301_v18 = vmul.f32 %v2299_v16, %v3783_v3 }
 0x5e9   : > { %2844 = vmatpush3.msk.msra.mxu0 %vm1868_vm9, %v3523_v37  ;;  %v2300_v19 = vmul.f32 %v2298_v17, %v3783_v3 }
 0x5ea   : > { %2124 = vxpose.xlu1.b32.cont [9/16] (narrow) %v2044_v21, 16  ;;  %2845 = vmatprep.subr.msk.mxu0 %vm1883_vm8, %v3523_v37  ;;  %v2304_v20 = vmul.f32 1.442695, %v2301_v18 }
 0x5eb   : > { %v1844_v25 = vpop.permute.xlu0 %1843  ;;  %v1739_v26 = vpop.permute.xlu1 %1738  ;;  %3365 = vxpose.xlu0.b32.cont [12/16] (narrow) %v3364_v22, 16  ;;  %v2302_v21 = vmul.f32 1.442695, %v2300_v19 }
 0x5ec   : > { %vm1902_vm11 = vcmp.eq.s32.totalorder %v3701_v29, %v1844_v25  ;;  %vm1867_vm12 = vcmp.eq.s32.totalorder %v3701_v29, %v1739_v26  ;;  %3386 = vpow2.f32 %v2304_v20 }
 0x5ed   : > { %2846 = vmatpush3.msk.msra.mxu0 %vm1867_vm12, %v3523_v37  ;;  %3105 = vmatprep.subr.msk.mxu1 %vm1902_vm11, %v3523_v37  ;;  %3388 = vpow2.f32 %v2302_v21 }
 0x5ee   : > { %2125 = vxpose.xlu1.b32.cont [10/16] (narrow) %v2045_v27, 16  ;;  %3106 = vmatpush3.msk.msra.mxu1 %vm1902_vm11, %v3523_v37 }
 0x5ef   : > { %v1784_v34 = vpop.permute.xlu0 %1783  ;;  %v1841_v35 = vpop.permute.xlu1 %1840  ;;  %3367 = vxpose.xlu0.b32.cont [13/16] (narrow) %v3366_v30, 16 }
 0x5f0   : > { %vm1882_vm13 = vcmp.eq.s32.totalorder %v3701_v29, %v1784_v34  ;;  %vm1901_vm14 = vcmp.eq.s32.totalorder %v3701_v29, %v1841_v35 }
 0x5f1   : > { %2847 = vmatprep.subr.msk.mxu0 %vm1882_vm13, %v3523_v37  ;;  %3107 = vmatprep.subr.msk.mxu1 %vm1901_vm14, %v3523_v37 }
 0x5f2   : > { %2126 = vxpose.xlu1.b32.cont [11/16] (narrow) %v2046_v36, 16  ;;  %3108 = vmatpush3.msk.msra.mxu1 %vm1901_vm14, %v3523_v37 }
 0x5f3   : > { %v1781_v50 = vpop.permute.xlu1 %1780  ;;  %v1736_v28 = vpop.permute.xlu0 %1735  ;;  %3369 = vxpose.xlu0.b32.cont [14/16] (narrow) %v3368_v38, 16 }
 0x5f4   : > { %vm1881_vm15 = vcmp.eq.s32.totalorder %v3701_v29, %v1781_v50  ;;  %vm1866_vm0 = vcmp.eq.s32.totalorder %v3701_v29, %v1736_v28 }
 0x5f5   : > { %2848 = vmatpush3.msk.msra.mxu0 %vm1866_vm0, %v3523_v37 }
 0x5f6   : > { %2127 = vxpose.xlu1.b32.cont [12/16] (narrow) %v2047_v51, 16  ;;  %2849 = vmatprep.subr.msk.mxu0 %vm1881_vm15, %v3523_v37 }
 0x5f7   : > { %v1838_v41 = vpop.permute.xlu0 %1837  ;;  %v1733_v52 = vpop.permute.xlu1 %1732  ;;  %3371 = vxpose.xlu0.b32.cont [15/16] (narrow) %v3370_v53, 16 }
 0x5f8   : > { %vm1900_vm1 = vcmp.eq.s32.totalorder %v3701_v29, %v1838_v41  ;;  %vm1865_vm2 = vcmp.eq.s32.totalorder %v3701_v29, %v1733_v52 }
 0x5f9   : > { %2850 = vmatpush3.msk.msra.mxu0 %vm1865_vm2, %v3523_v37  ;;  %3109 = vmatprep.subr.msk.mxu1 %vm1900_vm1, %v3523_v37 }
 0x5fa   : > { %2128 = vxpose.xlu1.b32.cont [13/16] (narrow) %v2048_v59, 16  ;;  %3110 = vmatpush3.msk.msra.mxu1 %vm1900_vm1, %v3523_v37 }
 0x5fb   : > { %v1778_v0 = vpop.permute.xlu0 %1777  ;;  %v1835_v1 = vpop.permute.xlu1 %1834  ;;  %3373 = vxpose.xlu0.b32.end [16/16] (narrow) %v3372_v63, 16 }
 0x5fc   : > { %vm1880_vm4 = vcmp.eq.s32.totalorder %v3701_v29, %v1778_v0  ;;  %vm1899_vm10 = vcmp.eq.s32.totalorder %v3701_v29, %v1835_v1 }
 0x5fd   : > { %2851 = vmatprep.subr.msk.mxu0 %vm1880_vm4, %v3523_v37  ;;  %3111 = vmatprep.subr.msk.mxu1 %vm1899_vm10, %v3523_v37 }
 0x5fe   : > { %2129 = vxpose.xlu1.b32.cont [14/16] (narrow) %v2049_v2, 16  ;;  %3112 = vmatpush3.msk.msra.mxu1 %vm1899_vm10, %v3523_v37 }
 0x5ff   : > { %v1775_v48 = vpop.permute.xlu1 %1774  ;;  %v1730_v60 = vpop.permute.xlu0 %1729 }
 0x600   : > { %vm1879_vm5 = vcmp.eq.s32.totalorder %v3701_v29, %v1775_v48  ;;  %vm1864_vm6 = vcmp.eq.s32.totalorder %v3701_v29, %v1730_v60 }
 0x601   : > { %2852 = vmatpush3.msk.msra.mxu0 %vm1864_vm6, %v3523_v37 }
 0x602   : > { %2130 = vxpose.xlu1.b32.cont [15/16] (narrow) %v2050_v4, 16  ;;  %2853 = vmatprep.subr.msk.mxu0 %vm1879_vm5, %v3523_v37 }
 0x603   : > { %v1832_v57 = vpop.permute.xlu0 %1831  ;;  %v1727_v5 = vpop.permute.xlu1 %1726 }
 0x604   : > { %vm1898_vm7 = vcmp.eq.s32.totalorder %v3701_v29, %v1832_v57  ;;  %vm1863_vm8 = vcmp.eq.s32.totalorder %v3701_v29, %v1727_v5 }
 0x605   : > { %2854 = vmatpush3.msk.msra.mxu0 %vm1863_vm8, %v3523_v37  ;;  %3113 = vmatprep.subr.msk.mxu1 %vm1898_vm7, %v3523_v37 }
 0x606   : > { %2131 = vxpose.xlu1.b32.end [16/16] (narrow) %v2051_v58, 16  ;;  %3114 = vmatpush3.msk.msra.mxu1 %vm1898_vm7, %v3523_v37 }
 0x607   : > { %v1772_v6 = vpop.permute.xlu0 %1771  ;;  %v1829_v7 = vpop.permute.xlu1 %1828 }
 0x608   : > { %vm1878_vm9 = vcmp.eq.s32.totalorder %v3701_v29, %v1772_v6  ;;  %vm1897_vm11 = vcmp.eq.s32.totalorder %v3701_v29, %v1829_v7 }
 0x609   : > { %2855 = vmatprep.subr.msk.mxu0 %vm1878_vm9, %v3523_v37  ;;  %3115 = vmatprep.subr.msk.mxu1 %vm1897_vm11, %v3523_v37 }
 0x60a   : > { %3116 = vmatpush3.msk.msra.mxu1 %vm1897_vm11, %v3523_v37 }
 0x60b   : > { %v1769_v8 = vpop.permute.xlu1 %1768  ;;  %v1724_v55 = vpop.permute.xlu0 %1723 }
 0x60c   : > { %vm1877_vm12 = vcmp.eq.s32.totalorder %v3701_v29, %v1769_v8  ;;  %vm1862_vm13 = vcmp.eq.s32.totalorder %v3701_v29, %v1724_v55 }
 0x60d   : > { %2856 = vmatpush3.msk.msra.mxu0 %vm1862_vm13, %v3523_v37 }
 0x60e   : > { %2857 = vmatprep.subr.msk.mxu0 %vm1877_vm12, %v3523_v37 }
 0x60f   : > { %v1826_v9 = vpop.permute.xlu0 %1825  ;;  %v1721_v56 = vpop.permute.xlu1 %1720 }
 0x610   : > { %vm1896_vm14 = vcmp.eq.s32.totalorder %v3701_v29, %v1826_v9  ;;  %vm1861_vm15 = vcmp.eq.s32.totalorder %v3701_v29, %v1721_v56 }
 0x611   : > { %2858 = vmatpush3.msk.msra.mxu0 %vm1861_vm15, %v3523_v37  ;;  %3117 = vmatprep.subr.msk.mxu1 %vm1896_vm14, %v3523_v37 }
 0x612   : > { %3118 = vmatpush3.msk.msra.mxu1 %vm1896_vm14, %v3523_v37 }
 0x613   : > { %v1766_v11 = vpop.permute.xlu0 %1765  ;;  %v1823_v12 = vpop.permute.xlu1 %1822 }
 0x614   : > { %vm1876_vm0 = vcmp.eq.s32.totalorder %v3701_v29, %v1766_v11  ;;  %vm1895_vm1 = vcmp.eq.s32.totalorder %v3701_v29, %v1823_v12 }
 0x615   : > { %2859 = vmatprep.subr.msk.mxu0 %vm1876_vm0, %v3523_v37  ;;  %3119 = vmatprep.subr.msk.mxu1 %vm1895_vm1, %v3523_v37 }
 0x616   : > { %3120 = vmatpush3.msk.msra.mxu1 %vm1895_vm1, %v3523_v37 }
 0x617   : > { %v1820_v13 = vpop.permute.xlu1 %1819  ;;  %v1718_v32 = vpop.permute.xlu0 %1717 }
 0x618   : > { %vm1894_vm2 = vcmp.eq.s32.totalorder %v3701_v29, %v1820_v13  ;;  %vm1860_vm4 = vcmp.eq.s32.totalorder %v3701_v29, %v1718_v32 }
 0x619   : > { %2860 = vmatpush3.msk.msra.mxu0 %vm1860_vm4, %v3523_v37  ;;  %3121 = vmatprep.subr.msk.mxu1 %vm1894_vm2, %v3523_v37 }
 0x61a   : > { %3122 = vmatpush3.msk.msra.mxu1 %vm1894_vm2, %v3523_v37 }
 0x61b   : > { %v1814_v42 = vpop.permute.xlu1 %1813  ;;  %v1817_v10 = vpop.permute.xlu0 %1816 }
 0x61c   : > { %vm1893_vm10 = vcmp.eq.s32.totalorder %v3701_v29, %v1817_v10  ;;  %vm1892_vm5 = vcmp.eq.s32.totalorder %v3701_v29, %v1814_v42 }
 0x61d   : > { %3123 = vmatprep.subr.msk.mxu1 %vm1893_vm10, %v3523_v37 }
 0x61e   : > { %3124 = vmatpush3.msk.msra.mxu1 %vm1893_vm10, %v3523_v37 }
 0x61f   : > { %3125 = vmatprep.subr.msk.mxu1 %vm1892_vm5, %v3523_v37 }
 0x620   : > { %3126 = vmatpush3.msk.msra.mxu1 %vm1892_vm5, %v3523_v37  ;;  %v3385_v37 = vpop.eup %3384 }
 0x621   : > { %2326 = vst.msk [vmem:[%s3660_s14] sm:$0x1] %vm1281_vm3, %v3385_v37  ;;  %v3387_v22 = vpop.eup %3386 }
 0x622   : > { %v3389_v23 = vpop.eup %3388  ;;  %v2307_v24 = vadd.f32 1.0, %v3387_v22 }
 0x623   : > { %v2306_v25 = vadd.f32 1.0, %v3389_v23 }
 0x624   : > { %3390 = vrcp.f32 %v2307_v24 }
 0x625   : > { %3392 = vrcp.f32 %v2306_v25 }
 0x631   : > { %v3391_v30 = vpop.eup %3390 }
 0x632   : > { %v3393_v34 = vpop.eup %3392  ;;  %v2314_v3 = vmul.f32 %v3391_v30, %v2312_v33  ;;  %v2316_v36 = vsub.f32 1.0, %v3391_v30 }
 0x633   : > { %v2313_v39 = vmul.f32 %v3393_v34, %v2312_v33  ;;  %v2315_v49 = vsub.f32 1.0, %v3393_v34 }
 0x634   : > { %v2318_v50 = vmul.f32 %v2316_v36, %v2314_v3 }
 0x635   : > { %v2317_v54 = vmul.f32 %v2315_v49, %v2313_v39 }
 0x63b   : > { %v3374_v43 = vpop.trf.xlu0 }
 0x63c   : > { %v3375_v44 = vunpack.i.l.bf16 %v3374_v43  ;;  %v3378_v45 = vunpack.i.h.bf16 %v3374_v43 }
 0x63e   : > { %2212 = vmatprep.mubr.f32.mxu0 %v3375_v44 }
 0x63f   : > { %v3379_v14 = vpop.trf.xlu0  ;;  %2213 = vmatmul.mubr.f32.vlgmr.msra.gmra.mxu0 %v3378_v45 }
 0x640   : > { %v3383_v46 = vunpack.i.h.bf16 %v3379_v14  ;;  %v3380_v47 = vunpack.i.l.bf16 %v3379_v14 }
 0x642   : > { %2217 = vmatprep.mubr.f32.mxu0 %v3380_v47 }
 0x643   : > { %2218 = vmatmul.mubr.f32.gmra.mxu0 %v3383_v46 }
 0x646   : > { %v2132_v29 = vpop.trf.xlu1 }
 0x647   : > { %3127 = vmatprep.mubr.f32.mxu1 %v2132_v29 }
 0x64a   : > { %v2133_v61 = vpop.trf.xlu1 }
 0x64b   : > { %3128 = vmatmul.mubr.f32.vlgmr.msra.gmra.mxu1 %v2133_v61 }
 0x6ff   : > { %v2861_v26 = vpop.f32.mrf.mxu0 }
 0x701   : > { %v2862_v27 = vpop.f32.mrf.mxu0 }
 0x702   : > { %v2863_v51 = vadd.f32 %v2862_v27, %v2861_v26 }
 0x703   : > { %v2864_v31 = vpop.f32.mrf.mxu0 }
 0x705   : > { %v2865_v35 = vpop.f32.mrf.mxu0 }
 0x706   : > { %v2866_v38 = vadd.f32 %v2865_v35, %v2864_v31 }
 0x70b   : > { %v3129_v28 = vpop.f32.mrf.mxu1 }
 0x70c   : > { %v2295_v53 = vadd.f32 %v3129_v28, %v2866_v38 }
 0x70d   : > { %v2289_v40 = vpop.f32.mrf.mxu1 }
 0x70e   : > { %v2320_v41 = vmul.f32 %v2318_v50, %v2295_v53  ;;  %v2290_v52 = vadd.f32 %v2863_v51, %v2289_v40 }
 0x710   : > { %2322 = vst [vmem:[%s3662_s25 + $0x8] sm:$0xff] %v2320_v41  ;;  %v2319_v59 = vmul.f32 %v2317_v54, %v2290_v52 }
 0x712   : > { %2321 = vst [vmem:[%s3662_s25] sm:$0xff] %v2319_v59 }
 0x713 PF: > { %s2701_s18 = sshll.u32 %s3504_s27, 4  ;;  %s2345_s19 = sshll.u32 %s3660_s14, 4  ;;  %s2346_s19 = int_to_ptr.vmem [resolvable:$true] %s2345_s19 }
 0x714   : > { %s2343_s9 = scalar_lea.hbm %s4394_s5, %s2701_s18  ;;  %s2328_s20 = scalar_lea.sflag [#allocation5], %s3636_s15 }
 0x715   : > { %s3394_s21 = scalar_lea.vmem %s2346_s19, 16  ;;  %s3524_s22 = smov [#allocation4]  }
 0x716   : > { %p3395_p2 = scmp.ne.s32.totalorder %s2346_s19, %s3394_s21  ;;  %s3398_s7 = sshll.u32 %s3524_s22, 4  ;;  %s3399_s7 = int_to_ptr.vmem [resolvable:$false] %s3398_s7 }
 0x717   : > { %s3400_s12 = scalar_lea.vmem %s3399_s7, 32  ;;  %p3401_p6 = scmp.lt.s32.totalorder %s2346_s19, %s3399_s7 }
 0x718   : > { %p3396_p4 = pnand %p3395_p2, %p3615_p3  ;;  %p3402_p7 = scmp.lt.s32.totalorder %s3400_s12, %s3394_s21 }
 0x71a   : > { %p3397_p5 = pneg %p3396_p4  ;;  %p3403_p8 = por %p3402_p7, %p3401_p6 }
 0x71c   : > { %p3404_p10 = pnand %p3403_p8, %p3397_p5 }
 0x71e   : > { %3407 = shalt.err (!%p3404_p10)
}
 0x71f   : > { %s3408_s13 = scalar_lea.hbm %s2343_s9, 16  ;;  %s3412_s16 = scalar_lea.hbm %s4394_s5, 32 }
 0x720   : > { %p3409_p11 = scmp.ne.s32.totalorder %s2343_s9, %s3408_s13  ;;  %p3413_p0 = scmp.lt.s32.totalorder %s2343_s9, %s4394_s5 }
 0x721   : > { %p3414_p1 = scmp.lt.s32.totalorder %s3412_s16, %s3408_s13 }
 0x722   : > { %p3410_p12 = pnand %p3409_p11, %p3615_p3 }
 0x723   : > { %p3415_p2 = por %p3414_p1, %p3413_p0 }
 0x724   : > { %p3411_p13 = pneg %p3410_p12 }
 0x726   : > { %p3416_p4 = pnand %p3415_p2, %p3411_p13 }
 0x728   : > { %3419 = shalt.err (!%p3416_p4)
}
 0x729   : > { %3146 = dma.vmem_to_hbm [thread:$0]  (%p3615_p3), %s2346_s19, 16, %s2343_s9, %s2328_s20  }
 0x72a   : > { %s2708_s17 = sshll.u32 %s3504_s27, 8  ;;  %s2358_s18 = sshll.u32 %s3662_s25, 4  ;;  %s4336_s18 = int_to_ptr.vmem [resolvable:$true] %s2358_s18 }
 0x72b   : > { %s4334_s21 = scalar_lea.hbm %s4395_s6, %s2708_s17  ;;  %s2332_s22 = scalar_lea.sflag [#allocation7], %s3636_s15 }
 0x72c   : > { %s3420_s7 = scalar_lea.vmem %s4336_s18, 256  ;;  %s3525_s12 = smov [#allocation6]  }
 0x72d   : > { %p3421_p5 = scmp.ne.s32.totalorder %s4336_s18, %s3420_s7  ;;  %s3424_s9 = sshll.u32 %s3525_s12, 4  ;;  %s3425_s9 = int_to_ptr.vmem [resolvable:$false] %s3424_s9 }
 0x72e   : > { %s3426_s25 = scalar_lea.vmem %s3425_s9, 512  ;;  %p3427_p8 = scmp.lt.s32.totalorder %s4336_s18, %s3425_s9 }
 0x72f   : > { %p3422_p6 = pnand %p3421_p5, %p3615_p3  ;;  %p3428_p10 = scmp.lt.s32.totalorder %s3426_s25, %s3420_s7 }
 0x731   : > { %p3423_p7 = pneg %p3422_p6  ;;  %p3429_p11 = por %p3428_p10, %p3427_p8 }
 0x733   : > { %p3430_p12 = pnand %p3429_p11, %p3423_p7 }
 0x735   : > { %3433 = shalt.err (!%p3430_p12)
}
 0x736   : > { %s3434_s27 = scalar_lea.hbm %s4334_s21, 256  ;;  %s3438_s13 = scalar_lea.hbm %s4395_s6, 512 }
 0x737   : > { %p3435_p13 = scmp.ne.s32.totalorder %s4334_s21, %s3434_s27  ;;  %p3439_p2 = scmp.lt.s32.totalorder %s4334_s21, %s4395_s6 }
 0x738   : > { %p3440_p4 = scmp.lt.s32.totalorder %s3438_s13, %s3434_s27 }
 0x739   : > { %p3436_p0 = pnand %p3435_p13, %p3615_p3 }
 0x73a   : > { %p3441_p5 = por %p3440_p4, %p3439_p2 }
 0x73b   : > { %p3437_p1 = pneg %p3436_p0 }
 0x73d   : > { %p3442_p6 = pnand %p3441_p5, %p3437_p1 }
 0x73f   : > { %3445 = shalt.err (!%p3442_p6)
}
 0x740   : > { %s3526_s16 = smov 128   ;;  %s3527_s29 = smov 8  }
 0x741   : > { %3147 = dma.vmem_to_hbm [thread:$0]  (%p3615_p3), %s4336_s18, 256, %s4334_s21, %s2332_s22, %s3526_s16, %s3526_s16, %s3527_s29  }
 0x742 PF: > { %p3157_p7 = scmp.ge.s32.totalorder %s3516_s30, 2  ;;  %s2373_s8 = sand.u32 1, %s3488_s23  }
 0x743   : > { %s2374_s17 = scalar_lea.sflag [#allocation5], %s2373_s8 }
 0x744   : > { %p3151_p8 = pnand %p3157_p7, %p3625_p9 }
 0x746   : > { %p3152_p10 = pneg %p3151_p8 }
 0x748   : > { %3479 = dma.done.wait (%p3152_p10), %s2374_s17, 16  }
 0x749   : > { %3481 = vsyncadd (%p3152_p10), %s2374_s17, 4294967280  ;;  %s2382_s0 = scalar_lea.sflag [#allocation7], %s2373_s8 }
 0x74a   : > { %3483 = dma.done.wait (%p3152_p10), %s2382_s0, 256  }
 0x74b   : > { %3485 = vsyncadd (%p3152_p10), %s2382_s0, 4294967040  ;;  %s24_s30 = sadd.s32 1, %s3516_s30   ;;  %s4410_s10 = sld [smem:[#allocation10_spill]] }
 0x74c   : > { %p21_p11 = scmp.ge.s32.totalorder %s24_s30, 8   ;;  %s4411_s25 = sld [smem:[#allocation15_spill]] }
 0x74d   : > { %s4412_s26 = sld [smem:[#allocation11_spill]]  ;;  %s4416_s23 = smov %s3492_s24 }
 0x74e   : > { %s4413_s27 = sld [smem:[#allocation12_spill]]  ;;  %23 = sbr.rel (!%p21_p11) target bundleno = 9 (0x9), region = 108 }
 0x74f   : > { %s4414_s28 = sld [smem:[#allocation13_spill]] }
 0x750   : > { %s4415_s29 = sld [smem:[#allocation14_spill]] }
 0x751   : > { %s4417_s24 = smov %s4410_s10 }
 0x753   :  { %2387 = vsyncpa [#allocation5], 1 }
 0x754   :  { %2389 = vsyncpa [#allocation5 + $0x1], 1 }
 0x755   :  { %2390 = vsyncpa [#allocation7], 1 }
 0x756   :  { %2392 = vsyncpa [#allocation7 + $0x1], 1 }

</bundles_post_ra>
